<compile_context>
chip_gen: v7x
topology: tpu7x:2x2x1
jax: 0.10.0
libtpu: 0.0.40
codegen_flags: <defaults>
</compile_context>

<pallas_src>
import functools

import jax
import jax.numpy as jnp
from jax.experimental import pallas as pl
from jax.experimental.pallas import tpu as pltpu

EPS = 1e-5  # PyTorch nn.LayerNorm default eps


def _round_up(v, m):
    return (v + m - 1) // m * m


def _pad2(a, rows, cols):
    return jnp.pad(a, ((0, rows - a.shape[0]), (0, cols - a.shape[1])))


def _itemsize(dt):
    return jnp.dtype(dt).itemsize


def _layernorm(v, n_true):
    """Exact two-pass LayerNorm normalization over the last (lane) axis.

    `v` may carry zero-padded lanes beyond `n_true`. The mean is exact (pad lanes are
    zero); centered values in the pad lanes are masked to zero before the squared sum,
    so the variance matches the unpadded math and padded lanes come out as exact zeros
    (keeping the downstream zero-padded matmuls/affines exact).
    """
    n_pad = v.shape[-1]
    inv = 1.0 / n_true
    mu = jnp.sum(v, axis=-1, keepdims=True) * inv
    c = v - mu
    if n_pad != n_true:
        lane = jax.lax.broadcasted_iota(jnp.int32, v.shape, v.ndim - 1)
        c = jnp.where(lane < n_true, c, 0.0)
    var = jnp.sum(c * c, axis=-1, keepdims=True) * inv
    return c * jax.lax.rsqrt(var + EPS)


def _autoencoder_kernel(x_ref, w1_ref, enc_ref, w2_ref, dec_ref, o_ref, *, d, e):
    x = x_ref[...].astype(jnp.float32)

    # ---- encoder ----
    # LayerNorm(input_dim): affine folded into w1/b1 -> normalize only.
    h = _layernorm(x, d)
    h = jnp.dot(h.astype(w1_ref.dtype), w1_ref[...], preferred_element_type=jnp.float32)
    h = h + enc_ref[0:1, :]                                    # b1' = b1 + beta1 @ W1
    # LayerNorm(encoding_dim) with affine, then ReLU.
    h = _layernorm(h, e) * enc_ref[1:2, :] + enc_ref[2:3, :]
    h = jnp.maximum(h, 0.0)

    # ---- decoder ----
    # LayerNorm(encoding_dim): affine folded into w2/b2 -> normalize only.
    h = _layernorm(h, e)
    h = jnp.dot(h.astype(w2_ref.dtype), w2_ref[...], preferred_element_type=jnp.float32)
    h = h + dec_ref[0:1, :]                                    # b2' = b2 + beta3 @ W2
    # LayerNorm(input_dim) with affine, then Sigmoid.
    h = _layernorm(h, d) * dec_ref[1:2, :] + dec_ref[2:3, :]
    o_ref[...] = jax.nn.sigmoid(h).astype(o_ref.dtype)


def make_params(key, input_dim, encoding_dim, dtype=jnp.float32):
    """Deterministic parameter init (nn.Linear-style bounds; LN affines randomized so the
    weight-folding path is exercised). Weights are (in_features, out_features): x @ W."""
    ks = jax.random.split(key, 12)
    bound1 = 1.0 / (input_dim ** 0.5)
    bound2 = 1.0 / (encoding_dim ** 0.5)
    return dict(
        ln1_g=jax.random.uniform(ks[0], (1, input_dim), dtype, 0.5, 1.5),
        ln1_b=jax.random.uniform(ks[1], (1, input_dim), dtype, -0.2, 0.2),
        w1=jax.random.uniform(ks[2], (input_dim, encoding_dim), dtype, -bound1, bound1),
        b1=jax.random.uniform(ks[3], (1, encoding_dim), dtype, -bound1, bound1),
        ln2_g=jax.random.uniform(ks[4], (1, encoding_dim), dtype, 0.5, 1.5),
        ln2_b=jax.random.uniform(ks[5], (1, encoding_dim), dtype, -0.2, 0.2),
        ln3_g=jax.random.uniform(ks[6], (1, encoding_dim), dtype, 0.5, 1.5),
        ln3_b=jax.random.uniform(ks[7], (1, encoding_dim), dtype, -0.2, 0.2),
        w2=jax.random.uniform(ks[8], (encoding_dim, input_dim), dtype, -bound2, bound2),
        b2=jax.random.uniform(ks[9], (1, input_dim), dtype, -bound2, bound2),
        ln4_g=jax.random.uniform(ks[10], (1, input_dim), dtype, 0.5, 1.5),
        ln4_b=jax.random.uniform(ks[11], (1, input_dim), dtype, -0.2, 0.2),
    )


def autoencoder_forward(x, params, *, matmul_dtype=jnp.bfloat16, block_rows=None):
    batch, d = x.shape
    e = params["w1"].shape[1]
    d_pad = _round_up(d, 128)
    e_pad = _round_up(e, 128)
    out_dtype = x.dtype

    # ---- exact fold of LN1 / LN3 affines into the adjacent Linear layers ----
    # (z*g + b) @ W + bias  ==  z @ (g[:,None]*W) + (bias + b @ W)
    w1 = params["ln1_g"].reshape(d, 1) * params["w1"]
    b1 = params["b1"] + params["ln1_b"] @ params["w1"]
    w2 = params["ln3_g"].reshape(e, 1) * params["w2"]
    b2 = params["b2"] + params["ln3_b"] @ params["w2"]

    # ---- one-time parameter packing (lane-aligned, zero padded) ----
    w1_p = _pad2(w1, d_pad, e_pad).astype(matmul_dtype)
    w2_p = _pad2(w2, e_pad, d_pad).astype(matmul_dtype)

    enc_pack = jnp.zeros((8, e_pad), jnp.float32)
    enc_pack = enc_pack.at[0, :e].set(b1[0].astype(jnp.float32))
    enc_pack = enc_pack.at[1, :e].set(params["ln2_g"][0].astype(jnp.float32))
    enc_pack = enc_pack.at[2, :e].set(params["ln2_b"][0].astype(jnp.float32))

    dec_pack = jnp.zeros((8, d_pad), jnp.float32)
    dec_pack = dec_pack.at[0, :d].set(b2[0].astype(jnp.float32))
    dec_pack = dec_pack.at[1, :d].set(params["ln4_g"][0].astype(jnp.float32))
    dec_pack = dec_pack.at[2, :d].set(params["ln4_b"][0].astype(jnp.float32))

    # ---- x: no batch padding; pad the feature axis only when it is not lane-aligned ----
    x_in = x if d_pad == d else jnp.pad(x, ((0, 0), (0, d_pad - d)))

    # ---- VMEM budgeting: weights single-buffered, row tiles double-buffered ----
    fixed_bytes = 2 * d_pad * e_pad * _itemsize(matmul_dtype) + 8 * (d_pad + e_pad) * 4
    per_row_bytes = 2 * d_pad * _itemsize(x_in.dtype) + 2 * d_pad * _itemsize(out_dtype)
    try:
        vmem_cap = int(pltpu.get_tpu_info().vmem_capacity_bytes)
    except Exception:
        vmem_cap = 64 * 1024 * 1024          # conservative (v7x per-TC)
    budget = int(vmem_cap * 0.75)            # ~48 MiB on v7x, ~96 MiB on v5e/v6e

    if block_rows is not None:
        tm = max(8, int(block_rows))
    else:
        tm = 2048                            # big row tiles amortize per-step overhead
        while tm > 8 and fixed_bytes + tm * per_row_bytes > budget:
            tm //= 2
    if tm >= batch:
        tm = batch                           # single full-batch block (always legal)
    else:
        tm = min(_round_up(tm, 8), batch)
    grid = pl.cdiv(batch, tm)

    needed = fixed_bytes + tm * per_row_bytes
    # headroom covers internal scratch and the double-buffered-weights fallback path
    vmem_limit = min(int(vmem_cap * 0.9), max(needed + fixed_bytes + (4 << 20), 16 << 20))

    # output is exactly (batch, d) when lane-aligned -> no wrapper slice / extra HBM copy
    out_shape = jax.ShapeDtypeStruct((batch, d_pad), out_dtype)
    kernel = functools.partial(_autoencoder_kernel, d=d, e=e)

    def build(single_buffer_weights):
        const_kw = {"pipeline_mode": pl.Buffered(1)} if single_buffer_weights else {}
        return pl.pallas_call(
            kernel,
            out_shape=out_shape,
            grid_spec=pltpu.PrefetchScalarGridSpec(
                num_scalar_prefetch=0,
                grid=(grid,),
                in_specs=[
                    pl.BlockSpec((tm, d_pad), lambda i: (i, 0)),                # x rows: pipelined
                    pl.BlockSpec((d_pad, e_pad), lambda i: (0, 0), **const_kw),  # w1: resident
                    pl.BlockSpec((8, e_pad), lambda i: (0, 0), **const_kw),      # b1'/gamma2/beta2
                    pl.BlockSpec((e_pad, d_pad), lambda i: (0, 0), **const_kw),  # w2: resident
                    pl.BlockSpec((8, d_pad), lambda i: (0, 0), **const_kw),      # b2'/gamma4/beta4
                ],
                out_specs=pl.BlockSpec((tm, d_pad), lambda i: (i, 0)),
            ),
            compiler_params=pltpu.CompilerParams(
                # "parallel" lets the runtime shard the row axis across TCs where supported
                # (v7x dual-TC); it is a no-op on single-TC chips.
                dimension_semantics=("parallel",),
                vmem_limit_bytes=int(vmem_limit),
            ),
        )

    try:
        out = build(True)(x_in, w1_p, enc_pack, w2_p, dec_pack)
        jax.block_until_ready(out)
    except Exception:
        # Fallback for jax versions without pipeline_mode / Buffered(1) support.
        out = build(False)(x_in, w1_p, enc_pack, w2_p, dec_pack)

    return out if d_pad == d else out[:, :d]


def autoencoder_ref(x, params):
    """Pure-JAX f32 reference with the original (unfolded, unpadded) parameters."""
    def ln(v, g, b):
        mu = jnp.mean(v, axis=-1, keepdims=True)
        var = jnp.mean(jnp.square(v - mu), axis=-1, keepdims=True)
        return (v - mu) / jnp.sqrt(var + EPS) * g + b

    h = ln(x, params["ln1_g"], params["ln1_b"])
    h = h @ params["w1"] + params["b1"]
    h = ln(h, params["ln2_g"], params["ln2_b"])
    h = jnp.maximum(h, 0.0)
    h = ln(h, params["ln3_g"], params["ln3_b"])
    h = h @ params["w2"] + params["b2"]
    h = ln(h, params["ln4_g"], params["ln4_b"])
    return jax.nn.sigmoid(h)


if __name__ == "__main__":
    key = jax.random.PRNGKey(0)
    k_x, k_p = jax.random.split(key)

    batch, input_dim, encoding_dim = 50, 64, 32
    x = jax.random.normal(k_x, (batch, input_dim), jnp.float32)
    params = make_params(k_p, input_dim, encoding_dim)

    # TODO(synk): dropout_rate is a constructor arg only (no nn.Dropout in forward), so it is omitted.

    ref = autoencoder_ref(x, params)

    # Exact-precision check (f32 MXU operands): validates the LN-affine fold, the padded-lane
    # masking, the two-pass LN rewrite and the ragged row grid (block_rows=16 -> 4 tiles, last
    # tile partial: 50 rows).
    out_f32 = autoencoder_forward(x, params, matmul_dtype=jnp.float32, block_rows=16)
    jax.block_until_ready(out_f32)
    assert out_f32.shape == (batch, input_dim)
    assert jnp.allclose(out_f32, ref, atol=1e-4, rtol=1e-4), "f32 path mismatch vs reference"

    # Default fast path: bf16 MXU operands (f32 accumulation, f32 elementwise math),
    # auto-sized row tile (single full-batch block here).
    out = autoencoder_forward(x, params)
    jax.block_until_ready(out)
    assert out.shape == (batch, input_dim)
    assert jnp.allclose(out, ref, atol=2e-2, rtol=0.0), "bf16 path mismatch vs reference"

    print("KERNEL_OK")
</pallas_src>

<mosaic_0001>
module attributes {stable_mosaic.version = 11 : i64} {
  func.func @_autoencoder_kernel(%arg0: i32, %arg1: memref<16x128xf32, #tpu.memory_space<vmem>>, %arg2: memref<128x128xf32, #tpu.memory_space<vmem>>, %arg3: memref<8x128xf32, #tpu.memory_space<vmem>>, %arg4: memref<128x128xf32, #tpu.memory_space<vmem>>, %arg5: memref<8x128xf32, #tpu.memory_space<vmem>>, %arg6: memref<16x128xf32, #tpu.memory_space<vmem>>) attributes {dimension_semantics = [#tpu.dimension_semantics<parallel>], iteration_bounds = array<i64: 4>, scalar_prefetch = 0 : i64, scratch_operands = 0 : i64, tpu.core_type = #tpu.core_type<tc>, window_params = [{transform_indices = @transform_0, window_bounds = array<i64: 16, 128>}, {pipeline_mode = #tpu.pipeline_mode<synchronous>, transform_indices = @transform_1, window_bounds = array<i64: 128, 128>}, {pipeline_mode = #tpu.pipeline_mode<synchronous>, transform_indices = @transform_2, window_bounds = array<i64: 8, 128>}, {pipeline_mode = #tpu.pipeline_mode<synchronous>, transform_indices = @transform_3, window_bounds = array<i64: 128, 128>}, {pipeline_mode = #tpu.pipeline_mode<synchronous>, transform_indices = @transform_4, window_bounds = array<i64: 8, 128>}, {transform_indices = @transform_5, window_bounds = array<i64: 16, 128>}]} {
    %c0 = arith.constant 0 : index
    %c0_0 = arith.constant 0 : index
    %0 = vector.load %arg1[%c0, %c0_0] : memref<16x128xf32, #tpu.memory_space<vmem>>, vector<16x128xf32>
    %cst = arith.constant dense<0.000000e+00> : vector<16xf32>
    %1 = vector.multi_reduction <add>, %0, %cst [1] : vector<16x128xf32> to vector<16xf32>
    %2 = vector.shape_cast %1 : vector<16xf32> to vector<16x1xf32>
    %cst_1 = arith.constant 1.562500e-02 : f32
    %3 = vector.broadcast %cst_1 : f32 to vector<16x1xf32>
    %4 = arith.mulf %2, %3 : vector<16x1xf32>
    %5 = vector.broadcast %4 : vector<16x1xf32> to vector<16x128xf32>
    %6 = arith.subf %0, %5 : vector<16x128xf32>
    %7 = tpu.iota {dimensions = array<i32: 1>} : vector<16x128xi32>
    %c64_i32 = arith.constant 64 : i32
    %8 = vector.broadcast %c64_i32 : i32 to vector<16x128xi32>
    %9 = arith.cmpi slt, %7, %8 : vector<16x128xi32>
    %cst_2 = arith.constant 0.000000e+00 : f32
    %10 = vector.broadcast %cst_2 : f32 to vector<16x128xf32>
    %11 = arith.select %9, %6, %10 : vector<16x128xi1>, vector<16x128xf32>
    %12 = arith.mulf %11, %11 : vector<16x128xf32>
    %cst_3 = arith.constant dense<0.000000e+00> : vector<16xf32>
    %13 = vector.multi_reduction <add>, %12, %cst_3 [1] : vector<16x128xf32> to vector<16xf32>
    %14 = vector.shape_cast %13 : vector<16xf32> to vector<16x1xf32>
    %cst_4 = arith.constant 1.562500e-02 : f32
    %15 = vector.broadcast %cst_4 : f32 to vector<16x1xf32>
    %16 = arith.mulf %14, %15 : vector<16x1xf32>
    %cst_5 = arith.constant 9.99999974E-6 : f32
    %17 = vector.broadcast %cst_5 : f32 to vector<16x1xf32>
    %18 = arith.addf %16, %17 : vector<16x1xf32>
    %19 = math.rsqrt %18 : vector<16x1xf32>
    %20 = vector.broadcast %19 : vector<16x1xf32> to vector<16x128xf32>
    %21 = arith.mulf %11, %20 : vector<16x128xf32>
    %c0_6 = arith.constant 0 : index
    %c0_7 = arith.constant 0 : index
    %22 = vector.load %arg2[%c0_6, %c0_7] : memref<128x128xf32, #tpu.memory_space<vmem>>, vector<128x128xf32>
    %cst_8 = arith.constant dense<0.000000e+00> : vector<16x128xf32>
    %23 = tpu.matmul %21, %22, %cst_8 {dimension_numbers = #tpu.dot_dimension_numbers<[1], [0], [0], [1], [0, 0, 1, 1], [], []>} : vector<16x128xf32>, vector<128x128xf32>, vector<16x128xf32> -> vector<16x128xf32>
    %c0_9 = arith.constant 0 : index
    %c0_10 = arith.constant 0 : index
    %24 = vector.load %arg3[%c0_9, %c0_10] : memref<8x128xf32, #tpu.memory_space<vmem>>, vector<1x128xf32>
    %25 = vector.broadcast %24 : vector<1x128xf32> to vector<16x128xf32>
    %26 = arith.addf %23, %25 : vector<16x128xf32>
    %cst_11 = arith.constant dense<0.000000e+00> : vector<16xf32>
    %27 = vector.multi_reduction <add>, %26, %cst_11 [1] : vector<16x128xf32> to vector<16xf32>
    %28 = vector.shape_cast %27 : vector<16xf32> to vector<16x1xf32>
    %cst_12 = arith.constant 3.125000e-02 : f32
    %29 = vector.broadcast %cst_12 : f32 to vector<16x1xf32>
    %30 = arith.mulf %28, %29 : vector<16x1xf32>
    %31 = vector.broadcast %30 : vector<16x1xf32> to vector<16x128xf32>
    %32 = arith.subf %26, %31 : vector<16x128xf32>
    %33 = tpu.iota {dimensions = array<i32: 1>} : vector<16x128xi32>
    %c32_i32 = arith.constant 32 : i32
    %34 = vector.broadcast %c32_i32 : i32 to vector<16x128xi32>
    %35 = arith.cmpi slt, %33, %34 : vector<16x128xi32>
    %cst_13 = arith.constant 0.000000e+00 : f32
    %36 = vector.broadcast %cst_13 : f32 to vector<16x128xf32>
    %37 = arith.select %35, %32, %36 : vector<16x128xi1>, vector<16x128xf32>
    %38 = arith.mulf %37, %37 : vector<16x128xf32>
    %cst_14 = arith.constant dense<0.000000e+00> : vector<16xf32>
    %39 = vector.multi_reduction <add>, %38, %cst_14 [1] : vector<16x128xf32> to vector<16xf32>
    %40 = vector.shape_cast %39 : vector<16xf32> to vector<16x1xf32>
    %cst_15 = arith.constant 3.125000e-02 : f32
    %41 = vector.broadcast %cst_15 : f32 to vector<16x1xf32>
    %42 = arith.mulf %40, %41 : vector<16x1xf32>
    %cst_16 = arith.constant 9.99999974E-6 : f32
    %43 = vector.broadcast %cst_16 : f32 to vector<16x1xf32>
    %44 = arith.addf %42, %43 : vector<16x1xf32>
    %45 = math.rsqrt %44 : vector<16x1xf32>
    %46 = vector.broadcast %45 : vector<16x1xf32> to vector<16x128xf32>
    %47 = arith.mulf %37, %46 : vector<16x128xf32>
    %c1 = arith.constant 1 : index
    %c0_17 = arith.constant 0 : index
    %48 = vector.load %arg3[%c1, %c0_17] : memref<8x128xf32, #tpu.memory_space<vmem>>, vector<1x128xf32>
    %49 = vector.broadcast %48 : vector<1x128xf32> to vector<16x128xf32>
    %50 = arith.mulf %47, %49 : vector<16x128xf32>
    %c2 = arith.constant 2 : index
    %c0_18 = arith.constant 0 : index
    %51 = vector.load %arg3[%c2, %c0_18] : memref<8x128xf32, #tpu.memory_space<vmem>>, vector<1x128xf32>
    %52 = vector.broadcast %51 : vector<1x128xf32> to vector<16x128xf32>
    %53 = arith.addf %50, %52 : vector<16x128xf32>
    %cst_19 = arith.constant 0.000000e+00 : f32
    %54 = vector.broadcast %cst_19 : f32 to vector<16x128xf32>
    %55 = arith.maximumf %53, %54 : vector<16x128xf32>
    %cst_20 = arith.constant dense<0.000000e+00> : vector<16xf32>
    %56 = vector.multi_reduction <add>, %55, %cst_20 [1] : vector<16x128xf32> to vector<16xf32>
    %57 = vector.shape_cast %56 : vector<16xf32> to vector<16x1xf32>
    %cst_21 = arith.constant 3.125000e-02 : f32
    %58 = vector.broadcast %cst_21 : f32 to vector<16x1xf32>
    %59 = arith.mulf %57, %58 : vector<16x1xf32>
    %60 = vector.broadcast %59 : vector<16x1xf32> to vector<16x128xf32>
    %61 = arith.subf %55, %60 : vector<16x128xf32>
    %62 = tpu.iota {dimensions = array<i32: 1>} : vector<16x128xi32>
    %c32_i32_22 = arith.constant 32 : i32
    %63 = vector.broadcast %c32_i32_22 : i32 to vector<16x128xi32>
    %64 = arith.cmpi slt, %62, %63 : vector<16x128xi32>
    %cst_23 = arith.constant 0.000000e+00 : f32
    %65 = vector.broadcast %cst_23 : f32 to vector<16x128xf32>
    %66 = arith.select %64, %61, %65 : vector<16x128xi1>, vector<16x128xf32>
    %67 = arith.mulf %66, %66 : vector<16x128xf32>
    %cst_24 = arith.constant dense<0.000000e+00> : vector<16xf32>
    %68 = vector.multi_reduction <add>, %67, %cst_24 [1] : vector<16x128xf32> to vector<16xf32>
    %69 = vector.shape_cast %68 : vector<16xf32> to vector<16x1xf32>
    %cst_25 = arith.constant 3.125000e-02 : f32
    %70 = vector.broadcast %cst_25 : f32 to vector<16x1xf32>
    %71 = arith.mulf %69, %70 : vector<16x1xf32>
    %cst_26 = arith.constant 9.99999974E-6 : f32
    %72 = vector.broadcast %cst_26 : f32 to vector<16x1xf32>
    %73 = arith.addf %71, %72 : vector<16x1xf32>
    %74 = math.rsqrt %73 : vector<16x1xf32>
    %75 = vector.broadcast %74 : vector<16x1xf32> to vector<16x128xf32>
    %76 = arith.mulf %66, %75 : vector<16x128xf32>
    %c0_27 = arith.constant 0 : index
    %c0_28 = arith.constant 0 : index
    %77 = vector.load %arg4[%c0_27, %c0_28] : memref<128x128xf32, #tpu.memory_space<vmem>>, vector<128x128xf32>
    %cst_29 = arith.constant dense<0.000000e+00> : vector<16x128xf32>
    %78 = tpu.matmul %76, %77, %cst_29 {dimension_numbers = #tpu.dot_dimension_numbers<[1], [0], [0], [1], [0, 0, 1, 1], [], []>} : vector<16x128xf32>, vector<128x128xf32>, vector<16x128xf32> -> vector<16x128xf32>
    %c0_30 = arith.constant 0 : index
    %c0_31 = arith.constant 0 : index
    %79 = vector.load %arg5[%c0_30, %c0_31] : memref<8x128xf32, #tpu.memory_space<vmem>>, vector<1x128xf32>
    %80 = vector.broadcast %79 : vector<1x128xf32> to vector<16x128xf32>
    %81 = arith.addf %78, %80 : vector<16x128xf32>
    %cst_32 = arith.constant dense<0.000000e+00> : vector<16xf32>
    %82 = vector.multi_reduction <add>, %81, %cst_32 [1] : vector<16x128xf32> to vector<16xf32>
    %83 = vector.shape_cast %82 : vector<16xf32> to vector<16x1xf32>
    %cst_33 = arith.constant 1.562500e-02 : f32
    %84 = vector.broadcast %cst_33 : f32 to vector<16x1xf32>
    %85 = arith.mulf %83, %84 : vector<16x1xf32>
    %86 = vector.broadcast %85 : vector<16x1xf32> to vector<16x128xf32>
    %87 = arith.subf %81, %86 : vector<16x128xf32>
    %88 = tpu.iota {dimensions = array<i32: 1>} : vector<16x128xi32>
    %c64_i32_34 = arith.constant 64 : i32
    %89 = vector.broadcast %c64_i32_34 : i32 to vector<16x128xi32>
    %90 = arith.cmpi slt, %88, %89 : vector<16x128xi32>
    %cst_35 = arith.constant 0.000000e+00 : f32
    %91 = vector.broadcast %cst_35 : f32 to vector<16x128xf32>
    %92 = arith.select %90, %87, %91 : vector<16x128xi1>, vector<16x128xf32>
    %93 = arith.mulf %92, %92 : vector<16x128xf32>
    %cst_36 = arith.constant dense<0.000000e+00> : vector<16xf32>
    %94 = vector.multi_reduction <add>, %93, %cst_36 [1] : vector<16x128xf32> to vector<16xf32>
    %95 = vector.shape_cast %94 : vector<16xf32> to vector<16x1xf32>
    %cst_37 = arith.constant 1.562500e-02 : f32
    %96 = vector.broadcast %cst_37 : f32 to vector<16x1xf32>
    %97 = arith.mulf %95, %96 : vector<16x1xf32>
    %cst_38 = arith.constant 9.99999974E-6 : f32
    %98 = vector.broadcast %cst_38 : f32 to vector<16x1xf32>
    %99 = arith.addf %97, %98 : vector<16x1xf32>
    %100 = math.rsqrt %99 : vector<16x1xf32>
    %101 = vector.broadcast %100 : vector<16x1xf32> to vector<16x128xf32>
    %102 = arith.mulf %92, %101 : vector<16x128xf32>
    %c1_39 = arith.constant 1 : index
    %c0_40 = arith.constant 0 : index
    %103 = vector.load %arg5[%c1_39, %c0_40] : memref<8x128xf32, #tpu.memory_space<vmem>>, vector<1x128xf32>
    %104 = vector.broadcast %103 : vector<1x128xf32> to vector<16x128xf32>
    %105 = arith.mulf %102, %104 : vector<16x128xf32>
    %c2_41 = arith.constant 2 : index
    %c0_42 = arith.constant 0 : index
    %106 = vector.load %arg5[%c2_41, %c0_42] : memref<8x128xf32, #tpu.memory_space<vmem>>, vector<1x128xf32>
    %107 = vector.broadcast %106 : vector<1x128xf32> to vector<16x128xf32>
    %108 = arith.addf %105, %107 : vector<16x128xf32>
    %109 = arith.negf %108 : vector<16x128xf32>
    %110 = math.exp %109 : vector<16x128xf32>
    %cst_43 = arith.constant 1.000000e+00 : f32
    %111 = vector.broadcast %cst_43 : f32 to vector<16x128xf32>
    %112 = arith.addf %111, %110 : vector<16x128xf32>
    %113 = arith.divf %111, %112 : vector<16x128xf32>
    %c0_44 = arith.constant 0 : index
    %c0_45 = arith.constant 0 : index
    %114 = vector.load %arg6[%c0_44, %c0_45] : memref<16x128xf32, #tpu.memory_space<vmem>>, vector<16x128xf32>
    tpu.vector_store %arg6[%c0_44, %c0_45], %113 {strides = array<i32>} : memref<16x128xf32, #tpu.memory_space<vmem>>, vector<16x128xf32>,
    return
  }
  func.func @transform_0(%arg0: i32) -> (i32, i32) {
    %c0_i32 = arith.constant 0 : i32
    %c0_i32_0 = arith.constant 0 : i32
    return %arg0, %c0_i32 : i32, i32
  }
  func.func @transform_1(%arg0: i32) -> (i32, i32) {
    %c0_i32 = arith.constant 0 : i32
    %c0_i32_0 = arith.constant 0 : i32
    %c0_i32_1 = arith.constant 0 : i32
    return %c0_i32, %c0_i32_0 : i32, i32
  }
  func.func @transform_2(%arg0: i32) -> (i32, i32) {
    %c0_i32 = arith.constant 0 : i32
    %c0_i32_0 = arith.constant 0 : i32
    %c0_i32_1 = arith.constant 0 : i32
    return %c0_i32, %c0_i32_0 : i32, i32
  }
  func.func @transform_3(%arg0: i32) -> (i32, i32) {
    %c0_i32 = arith.constant 0 : i32
    %c0_i32_0 = arith.constant 0 : i32
    %c0_i32_1 = arith.constant 0 : i32
    return %c0_i32, %c0_i32_0 : i32, i32
  }
  func.func @transform_4(%arg0: i32) -> (i32, i32) {
    %c0_i32 = arith.constant 0 : i32
    %c0_i32_0 = arith.constant 0 : i32
    %c0_i32_1 = arith.constant 0 : i32
    return %c0_i32, %c0_i32_0 : i32, i32
  }
  func.func @transform_5(%arg0: i32) -> (i32, i32) {
    %c0_i32 = arith.constant 0 : i32
    %c0_i32_0 = arith.constant 0 : i32
    return %arg0, %c0_i32 : i32, i32
  }
}

module attributes {stable_mosaic.version = 11 : i64} {
  func.func @_autoencoder_kernel(%arg0: i32, %arg1: memref<16x128xf32, #tpu.memory_space<vmem>>, %arg2: memref<128x128xf32, #tpu.memory_space<vmem>>, %arg3: memref<8x128xf32, #tpu.memory_space<vmem>>, %arg4: memref<128x128xf32, #tpu.memory_space<vmem>>, %arg5: memref<8x128xf32, #tpu.memory_space<vmem>>, %arg6: memref<16x128xf32, #tpu.memory_space<vmem>>) attributes {dimension_semantics = [#tpu.dimension_semantics<parallel>], iteration_bounds = array<i64: 4>, scalar_prefetch = 0 : i64, scratch_operands = 0 : i64, tpu.core_type = #tpu.core_type<tc>, window_params = [{transform_indices = @transform_0, window_bounds = array<i64: 16, 128>}, {pipeline_mode = #tpu.pipeline_mode<synchronous>, transform_indices = @transform_1, window_bounds = array<i64: 128, 128>}, {pipeline_mode = #tpu.pipeline_mode<synchronous>, transform_indices = @transform_2, window_bounds = array<i64: 8, 128>}, {pipeline_mode = #tpu.pipeline_mode<synchronous>, transform_indices = @transform_3, window_bounds = array<i64: 128, 128>}, {pipeline_mode = #tpu.pipeline_mode<synchronous>, transform_indices = @transform_4, window_bounds = array<i64: 8, 128>}, {transform_indices = @transform_5, window_bounds = array<i64: 16, 128>}]} {
    %c0 = arith.constant 0 : index
    %c0_0 = arith.constant 0 : index
    %0 = vector.load %arg1[%c0, %c0_0] : memref<16x128xf32, #tpu.memory_space<vmem>>, vector<16x128xf32>
    %cst = arith.constant dense<0.000000e+00> : vector<16xf32>
    %1 = vector.multi_reduction <add>, %0, %cst [1] : vector<16x128xf32> to vector<16xf32>
    %2 = vector.shape_cast %1 : vector<16xf32> to vector<16x1xf32>
    %cst_1 = arith.constant 1.562500e-02 : f32
    %3 = vector.broadcast %cst_1 : f32 to vector<16x1xf32>
    %4 = arith.mulf %2, %3 : vector<16x1xf32>
    %5 = vector.broadcast %4 : vector<16x1xf32> to vector<16x128xf32>
    %6 = arith.subf %0, %5 : vector<16x128xf32>
    %7 = tpu.iota {dimensions = array<i32: 1>} : vector<16x128xi32>
    %c64_i32 = arith.constant 64 : i32
    %8 = vector.broadcast %c64_i32 : i32 to vector<16x128xi32>
    %9 = arith.cmpi slt, %7, %8 : vector<16x128xi32>
    %cst_2 = arith.constant 0.000000e+00 : f32
    %10 = vector.broadcast %cst_2 : f32 to vector<16x128xf32>
    %11 = arith.select %9, %6, %10 : vector<16x128xi1>, vector<16x128xf32>
    %12 = arith.mulf %11, %11 : vector<16x128xf32>
    %cst_3 = arith.constant dense<0.000000e+00> : vector<16xf32>
    %13 = vector.multi_reduction <add>, %12, %cst_3 [1] : vector<16x128xf32> to vector<16xf32>
    %14 = vector.shape_cast %13 : vector<16xf32> to vector<16x1xf32>
    %cst_4 = arith.constant 1.562500e-02 : f32
    %15 = vector.broadcast %cst_4 : f32 to vector<16x1xf32>
    %16 = arith.mulf %14, %15 : vector<16x1xf32>
    %cst_5 = arith.constant 9.99999974E-6 : f32
    %17 = vector.broadcast %cst_5 : f32 to vector<16x1xf32>
    %18 = arith.addf %16, %17 : vector<16x1xf32>
    %19 = math.rsqrt %18 : vector<16x1xf32>
    %20 = vector.broadcast %19 : vector<16x1xf32> to vector<16x128xf32>
    %21 = arith.mulf %11, %20 : vector<16x128xf32>
    %c0_6 = arith.constant 0 : index
    %c0_7 = arith.constant 0 : index
    %22 = vector.load %arg2[%c0_6, %c0_7] : memref<128x128xf32, #tpu.memory_space<vmem>>, vector<128x128xf32>
    %cst_8 = arith.constant dense<0.000000e+00> : vector<16x128xf32>
    %23 = tpu.matmul %21, %22, %cst_8 {dimension_numbers = #tpu.dot_dimension_numbers<[1], [0], [0], [1], [0, 0, 1, 1], [], []>} : vector<16x128xf32>, vector<128x128xf32>, vector<16x128xf32> -> vector<16x128xf32>
    %c0_9 = arith.constant 0 : index
    %c0_10 = arith.constant 0 : index
    %24 = vector.load %arg3[%c0_9, %c0_10] : memref<8x128xf32, #tpu.memory_space<vmem>>, vector<1x128xf32>
    %25 = vector.broadcast %24 : vector<1x128xf32> to vector<16x128xf32>
    %26 = arith.addf %23, %25 : vector<16x128xf32>
    %cst_11 = arith.constant dense<0.000000e+00> : vector<16xf32>
    %27 = vector.multi_reduction <add>, %26, %cst_11 [1] : vector<16x128xf32> to vector<16xf32>
    %28 = vector.shape_cast %27 : vector<16xf32> to vector<16x1xf32>
    %cst_12 = arith.constant 3.125000e-02 : f32
    %29 = vector.broadcast %cst_12 : f32 to vector<16x1xf32>
    %30 = arith.mulf %28, %29 : vector<16x1xf32>
    %31 = vector.broadcast %30 : vector<16x1xf32> to vector<16x128xf32>
    %32 = arith.subf %26, %31 : vector<16x128xf32>
    %33 = tpu.iota {dimensions = array<i32: 1>} : vector<16x128xi32>
    %c32_i32 = arith.constant 32 : i32
    %34 = vector.broadcast %c32_i32 : i32 to vector<16x128xi32>
    %35 = arith.cmpi slt, %33, %34 : vector<16x128xi32>
    %cst_13 = arith.constant 0.000000e+00 : f32
    %36 = vector.broadcast %cst_13 : f32 to vector<16x128xf32>
    %37 = arith.select %35, %32, %36 : vector<16x128xi1>, vector<16x128xf32>
    %38 = arith.mulf %37, %37 : vector<16x128xf32>
    %cst_14 = arith.constant dense<0.000000e+00> : vector<16xf32>
    %39 = vector.multi_reduction <add>, %38, %cst_14 [1] : vector<16x128xf32> to vector<16xf32>
    %40 = vector.shape_cast %39 : vector<16xf32> to vector<16x1xf32>
    %cst_15 = arith.constant 3.125000e-02 : f32
    %41 = vector.broadcast %cst_15 : f32 to vector<16x1xf32>
    %42 = arith.mulf %40, %41 : vector<16x1xf32>
    %cst_16 = arith.constant 9.99999974E-6 : f32
    %43 = vector.broadcast %cst_16 : f32 to vector<16x1xf32>
    %44 = arith.addf %42, %43 : vector<16x1xf32>
    %45 = math.rsqrt %44 : vector<16x1xf32>
    %46 = vector.broadcast %45 : vector<16x1xf32> to vector<16x128xf32>
    %47 = arith.mulf %37, %46 : vector<16x128xf32>
    %c1 = arith.constant 1 : index
    %c0_17 = arith.constant 0 : index
    %48 = vector.load %arg3[%c1, %c0_17] : memref<8x128xf32, #tpu.memory_space<vmem>>, vector<1x128xf32>
    %49 = vector.broadcast %48 : vector<1x128xf32> to vector<16x128xf32>
    %50 = arith.mulf %47, %49 : vector<16x128xf32>
    %c2 = arith.constant 2 : index
    %c0_18 = arith.constant 0 : index
    %51 = vector.load %arg3[%c2, %c0_18] : memref<8x128xf32, #tpu.memory_space<vmem>>, vector<1x128xf32>
    %52 = vector.broadcast %51 : vector<1x128xf32> to vector<16x128xf32>
    %53 = arith.addf %50, %52 : vector<16x128xf32>
    %cst_19 = arith.constant 0.000000e+00 : f32
    %54 = vector.broadcast %cst_19 : f32 to vector<16x128xf32>
    %55 = arith.maximumf %53, %54 : vector<16x128xf32>
    %cst_20 = arith.constant dense<0.000000e+00> : vector<16xf32>
    %56 = vector.multi_reduction <add>, %55, %cst_20 [1] : vector<16x128xf32> to vector<16xf32>
    %57 = vector.shape_cast %56 : vector<16xf32> to vector<16x1xf32>
    %cst_21 = arith.constant 3.125000e-02 : f32
    %58 = vector.broadcast %cst_21 : f32 to vector<16x1xf32>
    %59 = arith.mulf %57, %58 : vector<16x1xf32>
    %60 = vector.broadcast %59 : vector<16x1xf32> to vector<16x128xf32>
    %61 = arith.subf %55, %60 : vector<16x128xf32>
    %62 = tpu.iota {dimensions = array<i32: 1>} : vector<16x128xi32>
    %c32_i32_22 = arith.constant 32 : i32
    %63 = vector.broadcast %c32_i32_22 : i32 to vector<16x128xi32>
    %64 = arith.cmpi slt, %62, %63 : vector<16x128xi32>
    %cst_23 = arith.constant 0.000000e+00 : f32
    %65 = vector.broadcast %cst_23 : f32 to vector<16x128xf32>
    %66 = arith.select %64, %61, %65 : vector<16x128xi1>, vector<16x128xf32>
    %67 = arith.mulf %66, %66 : vector<16x128xf32>
    %cst_24 = arith.constant dense<0.000000e+00> : vector<16xf32>
    %68 = vector.multi_reduction <add>, %67, %cst_24 [1] : vector<16x128xf32> to vector<16xf32>
    %69 = vector.shape_cast %68 : vector<16xf32> to vector<16x1xf32>
    %cst_25 = arith.constant 3.125000e-02 : f32
    %70 = vector.broadcast %cst_25 : f32 to vector<16x1xf32>
    %71 = arith.mulf %69, %70 : vector<16x1xf32>
    %cst_26 = arith.constant 9.99999974E-6 : f32
    %72 = vector.broadcast %cst_26 : f32 to vector<16x1xf32>
    %73 = arith.addf %71, %72 : vector<16x1xf32>
    %74 = math.rsqrt %73 : vector<16x1xf32>
    %75 = vector.broadcast %74 : vector<16x1xf32> to vector<16x128xf32>
    %76 = arith.mulf %66, %75 : vector<16x128xf32>
    %c0_27 = arith.constant 0 : index
    %c0_28 = arith.constant 0 : index
    %77 = vector.load %arg4[%c0_27, %c0_28] : memref<128x128xf32, #tpu.memory_space<vmem>>, vector<128x128xf32>
    %cst_29 = arith.constant dense<0.000000e+00> : vector<16x128xf32>
    %78 = tpu.matmul %76, %77, %cst_29 {dimension_numbers = #tpu.dot_dimension_numbers<[1], [0], [0], [1], [0, 0, 1, 1], [], []>} : vector<16x128xf32>, vector<128x128xf32>, vector<16x128xf32> -> vector<16x128xf32>
    %c0_30 = arith.constant 0 : index
    %c0_31 = arith.constant 0 : index
    %79 = vector.load %arg5[%c0_30, %c0_31] : memref<8x128xf32, #tpu.memory_space<vmem>>, vector<1x128xf32>
    %80 = vector.broadcast %79 : vector<1x128xf32> to vector<16x128xf32>
    %81 = arith.addf %78, %80 : vector<16x128xf32>
    %cst_32 = arith.constant dense<0.000000e+00> : vector<16xf32>
    %82 = vector.multi_reduction <add>, %81, %cst_32 [1] : vector<16x128xf32> to vector<16xf32>
    %83 = vector.shape_cast %82 : vector<16xf32> to vector<16x1xf32>
    %cst_33 = arith.constant 1.562500e-02 : f32
    %84 = vector.broadcast %cst_33 : f32 to vector<16x1xf32>
    %85 = arith.mulf %83, %84 : vector<16x1xf32>
    %86 = vector.broadcast %85 : vector<16x1xf32> to vector<16x128xf32>
    %87 = arith.subf %81, %86 : vector<16x128xf32>
    %88 = tpu.iota {dimensions = array<i32: 1>} : vector<16x128xi32>
    %c64_i32_34 = arith.constant 64 : i32
    %89 = vector.broadcast %c64_i32_34 : i32 to vector<16x128xi32>
    %90 = arith.cmpi slt, %88, %89 : vector<16x128xi32>
    %cst_35 = arith.constant 0.000000e+00 : f32
    %91 = vector.broadcast %cst_35 : f32 to vector<16x128xf32>
    %92 = arith.select %90, %87, %91 : vector<16x128xi1>, vector<16x128xf32>
    %93 = arith.mulf %92, %92 : vector<16x128xf32>
    %cst_36 = arith.constant dense<0.000000e+00> : vector<16xf32>
    %94 = vector.multi_reduction <add>, %93, %cst_36 [1] : vector<16x128xf32> to vector<16xf32>
    %95 = vector.shape_cast %94 : vector<16xf32> to vector<16x1xf32>
    %cst_37 = arith.constant 1.562500e-02 : f32
    %96 = vector.broadcast %cst_37 : f32 to vector<16x1xf32>
    %97 = arith.mulf %95, %96 : vector<16x1xf32>
    %cst_38 = arith.constant 9.99999974E-6 : f32
    %98 = vector.broadcast %cst_38 : f32 to vector<16x1xf32>
    %99 = arith.addf %97, %98 : vector<16x1xf32>
    %100 = math.rsqrt %99 : vector<16x1xf32>
    %101 = vector.broadcast %100 : vector<16x1xf32> to vector<16x128xf32>
    %102 = arith.mulf %92, %101 : vector<16x128xf32>
    %c1_39 = arith.constant 1 : index
    %c0_40 = arith.constant 0 : index
    %103 = vector.load %arg5[%c1_39, %c0_40] : memref<8x128xf32, #tpu.memory_space<vmem>>, vector<1x128xf32>
    %104 = vector.broadcast %103 : vector<1x128xf32> to vector<16x128xf32>
    %105 = arith.mulf %102, %104 : vector<16x128xf32>
    %c2_41 = arith.constant 2 : index
    %c0_42 = arith.constant 0 : index
    %106 = vector.load %arg5[%c2_41, %c0_42] : memref<8x128xf32, #tpu.memory_space<vmem>>, vector<1x128xf32>
    %107 = vector.broadcast %106 : vector<1x128xf32> to vector<16x128xf32>
    %108 = arith.addf %105, %107 : vector<16x128xf32>
    %109 = arith.negf %108 : vector<16x128xf32>
    %110 = math.exp %109 : vector<16x128xf32>
    %cst_43 = arith.constant 1.000000e+00 : f32
    %111 = vector.broadcast %cst_43 : f32 to vector<16x128xf32>
    %112 = arith.addf %111, %110 : vector<16x128xf32>
    %113 = arith.divf %111, %112 : vector<16x128xf32>
    %c0_44 = arith.constant 0 : index
    %c0_45 = arith.constant 0 : index
    %114 = vector.load %arg6[%c0_44, %c0_45] : memref<16x128xf32, #tpu.memory_space<vmem>>, vector<16x128xf32>
    tpu.vector_store %arg6[%c0_44, %c0_45], %113 {strides = array<i32>} : memref<16x128xf32, #tpu.memory_space<vmem>>, vector<16x128xf32>,
    return
  }
  func.func @transform_0(%arg0: i32) -> (i32, i32) {
    %c0_i32 = arith.constant 0 : i32
    %c0_i32_0 = arith.constant 0 : i32
    return %arg0, %c0_i32 : i32, i32
  }
  func.func @transform_1(%arg0: i32) -> (i32, i32) {
    %c0_i32 = arith.constant 0 : i32
    %c0_i32_0 = arith.constant 0 : i32
    %c0_i32_1 = arith.constant 0 : i32
    return %c0_i32, %c0_i32_0 : i32, i32
  }
  func.func @transform_2(%arg0: i32) -> (i32, i32) {
    %c0_i32 = arith.constant 0 : i32
    %c0_i32_0 = arith.constant 0 : i32
    %c0_i32_1 = arith.constant 0 : i32
    return %c0_i32, %c0_i32_0 : i32, i32
  }
  func.func @transform_3(%arg0: i32) -> (i32, i32) {
    %c0_i32 = arith.constant 0 : i32
    %c0_i32_0 = arith.constant 0 : i32
    %c0_i32_1 = arith.constant 0 : i32
    return %c0_i32, %c0_i32_0 : i32, i32
  }
  func.func @transform_4(%arg0: i32) -> (i32, i32) {
    %c0_i32 = arith.constant 0 : i32
    %c0_i32_0 = arith.constant 0 : i32
    %c0_i32_1 = arith.constant 0 : i32
    return %c0_i32, %c0_i32_0 : i32, i32
  }
  func.func @transform_5(%arg0: i32) -> (i32, i32) {
    %c0_i32 = arith.constant 0 : i32
    %c0_i32_0 = arith.constant 0 : i32
    return %arg0, %c0_i32 : i32, i32
  }
}

</mosaic_0001>

<bundles_post_ra>
// kernel: tpu_custom_call.1
= control target key start
LH: loop header
LB: loop body
LE: loop exit
PB: predicated region body
PF: predicated region fallthrough
CT: control target
= control target key end

     0   :  { %10 = vsyncpa [#allocation3], 0  ;;  %s1601_s0 = inlined_call_operand.hbm [shape: f32[50,128], index: 0, kind: input, shape index: {}]   ;;  %s1602_s1 = inlined_call_operand.hbm [shape: f32[128,128], index: 1, kind: input, shape index: {}]   ;;  %s1603_s2 = inlined_call_operand.hbm [shape: f32[8,128], index: 2, kind: input, shape index: {}]   ;;  %s1604_s3 = inlined_call_operand.hbm [shape: f32[128,128], index: 3, kind: input, shape index: {}]   ;;  %s1605_s4 = inlined_call_operand.vmem [shape: f32[8,128], index: 4, kind: input, shape index: {}]   ;;  %s1606_s5 = inlined_call_operand.hbm [shape: f32[50,128], index: 5, kind: output, shape index: {}]  }
   0x1   :  { %12 = vsyncpa [#allocation3 + $0x1], 0 }
   0x2   :  { %13 = vsyncpa [#allocation6], 0 }
   0x3   :  { %14 = vsyncpa [#allocation9], 0 }
   0x4   :  { %15 = vsyncpa [#allocation4], 0 }
   0x5   :  { %17 = vsyncpa [#allocation4 + $0x1], 0  ;;  %s1298_s18 = smov 0   ;;  %s1300_s19 = smov 0  }
   0x6   :  { %s1302_s20 = smov 0   ;;  %s1304_s21 = smov 0  }
   0x7 LB: > { %s1319_s22 = sadd.s32 4294967295, %s1255_s21   ;;  %s761_s23 = sadd.s32 4294967294, %s1255_s21   ;;  %s1255_s21 = sphi %s1304_s21, %s1632_s21   ;;  %s1251_s20 = sphi %s1302_s20, %s1636_s20   ;;  %s1247_s19 = sphi %s1300_s19, %s1635_s19   ;;  %s1243_s18 = sphi %s1298_s18, %s1634_s18  }
   0x8   : > { %s1323_s24 = sadd.s32 1, %s1255_s21   ;;  %s30_s25 = sadd.s32 1, %s1251_s20 }
   0x9   : > { %1613 = sst [smem:[#allocation15_spill]] %s1323_s24  ;;  %s27_s26 = ssub.s32 %s1255_s21, %s1323_s24 }
   0xa   : > { %p37_p0 = scmp.ne.s32.totalorder %s1251_s20, %s1247_s19  ;;  %p28_p1 = scmp.eq.s32.totalorder %s27_s26, 0 }
   0xb   : > { %p38_p2 = scmp.eq.s32.totalorder %s1255_s21, 0  ;;  %p43_p3 = scmp.ne.s32.totalorder %s1247_s19, %s1243_s18 }
   0xc   : > { %p1607_p4 = scmp.eq.s32.totalorder %s1319_s22, 0  ;;  %p151_p7 = scmp.eq.s32.totalorder %s1319_s22, 3 }
   0xd   : > { %s1335_s27 = scalar_select %p28_p1, %s1251_s20, %s30_s25  }
   0xe   : > { %p1337_p5 = por %p38_p2, %p37_p0  ;;  %p1343_p6 = por %p1607_p4, %p43_p3 }
   0xf   : > { %1614 = sst [smem:[#allocation16_spill]] %s1335_s27  ;;  %p157_p8 = scmp.eq.s32.totalorder %s761_s23, 3 }
  0x10   : > { %s1615_s28 = scalar_select %p1337_p5, 1, 0 }
  0x11   : > { %s1616_s29 = scalar_select %p1343_p6, 1, 0 }
  0x12   : > { %p762_p9 = scmp.ge.s32.totalorder %s1255_s21, 1  ;;  %p164_p10 = scmp.lt.s32.totalorder %s1255_s21, 5 }
  0x13   : > { %p1350_p11 = por %p151_p7, %p37_p0  ;;  %p1354_p12 = por %p157_p8, %p43_p3 }
  0x14   : > { %p1358_p13 = pnand %p762_p9, %p164_p10  ;;  %s1257_s8 = smov [#allocation5]  }
  0x15   : > { %s1617_s30 = scalar_select %p1350_p11, 1, 0 }
  0x16   : > { %s1618_s6 = scalar_select %p1354_p12, 1, 0 }
  0x17   : > { %s1619_s7 = scalar_select %p1358_p13, 1, 0 }
  0x18   : > { %p983_p1 = pneg %p1358_p13  ;;  %s176_s9 = sshll.u32 %s1257_s8, 4  ;;  %s177_s9 = int_to_ptr.vmem [resolvable:$true] %s176_s9 }
  0x19   : > { %s1258_s11 = smov [#allocation7]   ;;  %s1069_s15 = scalar_lea.hbm %s1602_s1, 2048 }
  0x1a   : > { %p1366_p2 = pnand %p983_p1, %p1607_p4  ;;  %s190_s12 = sshll.u32 %s1258_s11, 4  ;;  %s1370_s12 = int_to_ptr.vmem [resolvable:$true] %s190_s12 }
  0x1b   : > { %p1070_p0 = scmp.ne.s32.totalorder %s1602_s1, %s1069_s15  ;;  %p1076_p9 = scmp.lt.u32.totalorder %s1069_s15, %s1602_s1 }
  0x1c   : > { %p1380_p3 = pneg %p1366_p2 }
  0x1e   : > { %p1072_p7 = pnand %p1380_p3, %p1070_p0 }
  0x20   : > { %p1073_p8 = pneg %p1072_p7 }
  0x22   : > { %p1078_p10 = pnand %p1076_p9, %p1073_p8 }
  0x24   : > { %1081 = shalt.err (!%p1078_p10)
}
  0x25   : > { %s1082_s8 = scalar_lea.vmem %s177_s9, 2048  ;;  %p1090_p11 = scmp.lt.s32.totalorder %s177_s9, %s177_s9 }
  0x26   : > { %p1083_p1 = scmp.ne.s32.totalorder %s177_s9, %s1082_s8  ;;  %p1091_p6 = scmp.lt.s32.totalorder %s1082_s8, %s1082_s8 }
  0x28   : > { %p1085_p4 = pnand %p1083_p1, %p1380_p3  ;;  %p1092_p13 = por %p1091_p6, %p1090_p11 }
  0x2a   : > { %p1086_p12 = pneg %p1085_p4 }
  0x2c   : > { %p1093_p5 = pnand %p1092_p13, %p1086_p12 }
  0x2e   : > { %1096 = shalt.err (!%p1093_p5)
}
  0x2f   : > { %s1612_s11 = smov 128   ;;  %s1260_s13 = smov 8  }
  0x30   : > { %986 = dma.hbm_to_vmem [thread:$0]  (!%p1366_p2), %s1602_s1, 2048, %s177_s9, [#allocation6], %s1612_s11, %s1612_s11, %s1260_s13  }
  0x31   : > { %s1097_s25 = scalar_lea.hbm %s1603_s2, 128 }
  0x32   : > { %p1098_p4 = scmp.ne.s32.totalorder %s1603_s2, %s1097_s25  ;;  %p1104_p11 = scmp.lt.u32.totalorder %s1097_s25, %s1603_s2 }
  0x34   : > { %p1100_p5 = pnand %p1098_p4, %p1380_p3 }
  0x36   : > { %p1101_p6 = pneg %p1100_p5 }
  0x38   : > { %p1106_p12 = pnand %p1104_p11, %p1101_p6 }
  0x3a   : > { %1109 = shalt.err (!%p1106_p12)
}
  0x3b   : > { %s1110_s9 = scalar_lea.vmem %s1370_s12, 128  ;;  %p1118_p8 = scmp.lt.s32.totalorder %s1370_s12, %s1370_s12 }
  0x3c   : > { %p1111_p13 = scmp.ne.s32.totalorder %s1370_s12, %s1110_s9  ;;  %p1119_p9 = scmp.lt.s32.totalorder %s1110_s9, %s1110_s9 }
  0x3e   : > { %p1113_p0 = pnand %p1111_p13, %p1380_p3  ;;  %p1120_p10 = por %p1119_p9, %p1118_p8 }
  0x40   : > { %p1114_p7 = pneg %p1113_p0 }
  0x42   : > { %p1121_p1 = pnand %p1120_p10, %p1114_p7 }
  0x44   : > { %1124 = shalt.err (!%p1121_p1)
}
  0x45   : > { %989 = dma.hbm_to_vmem [thread:$0]  (!%p1366_p2), %s1603_s2, 128, %s1370_s12, [#allocation6]  }
  0x46   : > { %s1261_s14 = smov [#allocation8]   ;;  %s1125_s25 = scalar_lea.hbm %s1604_s3, 2048 }
  0x47   : > { %s200_s15 = sshll.u32 %s1261_s14, 4  ;;  %p1126_p4 = scmp.ne.s32.totalorder %s1604_s3, %s1125_s25  ;;  %s201_s15 = int_to_ptr.vmem [resolvable:$true] %s200_s15 }
  0x48   : > { %p1132_p11 = scmp.lt.u32.totalorder %s1125_s25, %s1604_s3 }
  0x49   : > { %p1128_p5 = pnand %p1126_p4, %p1380_p3 }
  0x4b   : > { %p1129_p6 = pneg %p1128_p5 }
  0x4d   : > { %p1134_p12 = pnand %p1132_p11, %p1129_p6 }
  0x4f   : > { %1137 = shalt.err (!%p1134_p12)
}
  0x50   : > { %s1138_s12 = scalar_lea.vmem %s201_s15, 2048  ;;  %p1146_p8 = scmp.lt.s32.totalorder %s201_s15, %s201_s15 }
  0x51   : > { %p1139_p13 = scmp.ne.s32.totalorder %s201_s15, %s1138_s12  ;;  %p1147_p9 = scmp.lt.s32.totalorder %s1138_s12, %s1138_s12 }
  0x53   : > { %p1141_p0 = pnand %p1139_p13, %p1380_p3  ;;  %p1148_p10 = por %p1147_p9, %p1146_p8 }
  0x55   : > { %p1142_p7 = pneg %p1141_p0 }
  0x57   : > { %p1149_p1 = pnand %p1148_p10, %p1142_p7 }
  0x59   : > { %1152 = shalt.err (!%p1149_p1)
}
  0x5a   : > { %s1622_s24 = smov 128   ;;  %p766_p4 = scmp.ge.s32.totalorder %s1255_s21, 4 }
  0x5b   : > { %992 = dma.hbm_to_vmem [thread:$0]  (!%p1366_p2), %s1604_s3, 2048, %s201_s15, [#allocation9], %s1622_s24, %s1622_s24, %s1260_s13  }
  0x5c   : > { %213 = sbr.rel (%p766_p4) target bundleno = 134 (0x86), region = 32  ;;  %p1623_p3 = scmp.ne.s32.totalorder (!%p766_p4), %s1615_s28, 0 }
  0x63   : > { %216 = sbr.rel (!%p1623_p3) target bundleno = 134 (0x86), region = 36  ;;  %s217_s23 = sand.u32 (%p1623_p3), 1, %s1251_s20  }
  0x64   : > { %s768_s14 = sshll.u32 (%p1623_p3), %s1255_s21, 1  ;;  %s767_s16 = sshll.u32 (%p1623_p3), %s217_s23, 4 }
  0x65   : > { %s223_s17 = ssub.s32 (%p1623_p3), 7, %s768_s14  ;;  %s1451_s26 = scalar_lea.sflag (%p1623_p3), [#allocation3], %s217_s23 }
  0x66   : > { %p224_p5 = scmp.lt.s32.totalorder (%p1623_p3), %s223_s17, 2  ;;  %s221_s13 = scalar_lea.vmem (%p1623_p3), [#allocation2], %s767_s16 }
  0x6a   : > { %s1638_s17 = smov (!%p224_p5, %s223_s17), 2 }
  0x6b   : > { %s1448_s10 = sshll.u32 %s1638_s17, 7 }
  0x6c   : > { %s228_s25 = ssub.s32 256, %s1448_s10 }
  0x6d   : > { %229 = vsyncadd %s1451_s26, %s228_s25  ;;  %p770_p2 = scmp.ne.s32.totalorder %s1448_s10, 0  ;;  %s797_s28 = sshll.u32 %s1255_s21, 8 }
  0x6e   : > { %s1459_s9 = scalar_lea.hbm %s1601_s0, %s797_s28  ;;  %s234_s12 = sshll.u32 %s221_s13, 4  ;;  %s1461_s12 = int_to_ptr.vmem [resolvable:$true] %s234_s12 }
  0x6f   : > { %s1153_s24 = scalar_lea.hbm %s1459_s9, %s1448_s10  ;;  %s1157_s23 = scalar_lea.hbm %s1601_s0, 896 }
  0x70   : > { %p1154_p6 = scmp.ne.s32.totalorder %s1459_s9, %s1153_s24  ;;  %p1158_p13 = scmp.lt.u32.totalorder %s1459_s9, %s1601_s0 }
  0x71   : > { %p1159_p0 = scmp.lt.u32.totalorder %s1157_s23, %s1153_s24  ;;  %p1161_p8 = scmp.lt.u32.totalorder %s1153_s24, %s1459_s9 }
  0x72   : > { %p1155_p11 = pnand %p1154_p6, %p770_p2 }
  0x73   : > { %p1160_p7 = por %p1159_p0, %p1158_p13 }
  0x74   : > { %p1156_p12 = pneg %p1155_p11 }
  0x75   : > { %p1162_p9 = por %p1161_p8, %p1160_p7 }
  0x77   : > { %p1163_p10 = pnand %p1162_p9, %p1156_p12 }
  0x79   : > { %1166 = shalt.err (!%p1163_p10)
}
  0x7a   : > { %s1167_s17 = scalar_lea.vmem %s1461_s12, %s1448_s10  ;;  %s1262_s25 = smov [#allocation2]  }
  0x7b   : > { %p1168_p1 = scmp.ne.s32.totalorder %s1461_s12, %s1167_s17  ;;  %s1171_s13 = sshll.u32 %s1262_s25, 4  ;;  %s1172_s13 = int_to_ptr.vmem [resolvable:$false] %s1171_s13 }
  0x7c   : > { %s1173_s28 = scalar_lea.vmem %s1172_s13, 512  ;;  %p1174_p5 = scmp.lt.s32.totalorder %s1461_s12, %s1172_s13 }
  0x7d   : > { %p1169_p4 = pnand %p1168_p1, %p770_p2  ;;  %p1175_p6 = scmp.lt.s32.totalorder %s1173_s28, %s1167_s17 }
  0x7f   : > { %p1170_p3 = pneg %p1169_p4  ;;  %p1176_p11 = por %p1175_p6, %p1174_p5 }
  0x81   : > { %p1177_p13 = pnand %p1176_p11, %p1170_p3 }
  0x83   : > { %1180 = shalt.err (!%p1177_p13)
}
  0x84   : > { %s1263_s15 = smov 128   ;;  %s1264_s8 = smov 8  }
  0x85   : > { %240 = dma.hbm_to_vmem [thread:$0]  (%p770_p2), %s1459_s9, %s1448_s10, %s1461_s12, %s1451_s26, %s1263_s15, %s1263_s15, %s1264_s8  }
  0x86 PF: > { %p1624_p12 = scmp.ne.s32.totalorder %s1619_s7, 0 }
  0x87   : > { %s1491_s24 = sand.u32 (!%p1624_p12), 1, %s1247_s19   ;;  %p1625_p0 = scmp.ne.s32.totalorder (!%p1624_p12), %s1616_s29, 0 }
  0x88   : > { %246 = sbr.rel (%p1624_p12) target bundleno = 1883 (0x75b), region = 40  ;;  %s775_s11 = sshll.u32 (!%p1624_p12), %s1491_s24, 4 }
  0x89   : > { %s249_s27 = scalar_lea.sflag (!%p1624_p12), [#allocation3], %s1491_s24  ;;  %s252_s23 = scalar_lea.vmem (!%p1624_p12), [#allocation2], %s775_s11 }
  0x8f   : > { %1226 = dma.done.wait (%p1625_p0), %s249_s27, 256  }
  0x90   : > { %1228 = vsyncadd (%p1625_p0), %s249_s27, 4294967040  ;;  %p1626_p2 = scmp.eq.s32.totalorder %s1319_s22, 0 }
  0x92   : > { %1230 = dma.done.wait (%p1626_p2), [#allocation6], 2176   ;;  %p1627_p7 = pmov %p1626_p2 }
  0x93   : > { %p1628_p8 = pmov %p1626_p2 }
  0x94   : > { %1232 = vsyncadd (%p1627_p7), [#allocation6], 4294965120 }
  0x95   : > { %1234 = dma.done.wait (%p1628_p8), [#allocation9], 2048   ;;  %p1629_p9 = pmov %p1626_p2 }
  0x96   : > { %v301_v0 = vld [vmem:[%s252_s23] sm:$0xff]  ;;  %v302_v1 = vld [vmem:[%s252_s23 + $0x8] sm:$0xff]  ;;  %v311_v11 = vlaneseq  ;;  %s290_s14 = scalar_lea.vmem [#allocation10], %s775_s11  ;;  %s640_s16 = scalar_lea.sflag [#allocation4], %s1491_s24 }
  0x97   : > { %1236 = vsyncadd (%p1629_p9), [#allocation9], 4294965248  ;;  %303 = vadd.xlane.f32.xlu0 %v301_v0  ;;  %v330_v2 = vld [vmem:[#allocation5] sm:$0xff]  ;;  %v331_v3 = vld [vmem:[#allocation5 + $0x8] sm:$0xff]  ;;  %p1630_p10 = scmp.ne.s32.totalorder %s1617_s30, 0 }
  0x98   : > { %v332_v4 = vld [vmem:[#allocation5 + $0x10] sm:$0xff]  ;;  %v905_v5 = vpack.c.bf16 %v331_v3, %v330_v2  ;;  %v333_v6 = vld [vmem:[#allocation5 + $0x18] sm:$0xff]  ;;  %v334_v8 = vld [vmem:[#allocation5 + $0x20] sm:$0xff]  ;;  %v1509_v12 = vand.u32 127, %v311_v11  ;;  %s789_s17 = sshll.u32 (%p1630_p10), %s1319_s22, 1 }
  0x99   : > { %v909_v7 = vpack.c.bf16 %v333_v6, %v332_v4  ;;  %v335_v9 = vld [vmem:[#allocation5 + $0x28] sm:$0xff]  ;;  %v336_v23 = vld [vmem:[#allocation5 + $0x30] sm:$0xff]  ;;  %v337_v24 = vld [vmem:[#allocation5 + $0x38] sm:$0xff]  ;;  %s648_s25 = ssub.s32 (%p1630_p10), 7, %s789_s17 }
  0x9a   : > { %906 = vmatprep.subr.bf16.mxu0 %v905_v5  ;;  %v913_v10 = vpack.c.bf16 %v335_v9, %v334_v8  ;;  %vm313_vm0 = vcmp.lt.s32.totalorder %v1509_v12, 64  ;;  %v917_v25 = vpack.c.bf16 %v337_v24, %v336_v23  ;;  %v338_v26 = vld [vmem:[#allocation5 + $0x40] sm:$0xff]  ;;  %v339_v27 = vld [vmem:[#allocation5 + $0x48] sm:$0xff]  ;;  %v340_v29 = vld [vmem:[#allocation5 + $0x50] sm:$0xff]  ;;  %vm434_vm1 = vcmp.lt.s32.totalorder %v1509_v12, 32  ;;  %p649_p1 = scmp.lt.s32.totalorder (%p1630_p10), %s648_s25, 2 }
  0x9b   : > { %305 = vadd.xlane.f32.xlu0 %v302_v1  ;;  %908 = vmatpush3.bf16.msra.mxu0 %v905_v5  ;;  %v921_v28 = vpack.c.bf16 %v339_v27, %v338_v26  ;;  %v341_v30 = vld [vmem:[#allocation5 + $0x58] sm:$0xff]  ;;  %v342_v32 = vld [vmem:[#allocation5 + $0x60] sm:$0xff]  ;;  %v343_v33 = vld [vmem:[#allocation5 + $0x68] sm:$0xff] }
  0x9c   : > { %910 = vmatprep.subr.bf16.mxu0 %v909_v7  ;;  %v925_v31 = vpack.c.bf16 %v341_v30, %v340_v29  ;;  %v344_v34 = vld [vmem:[#allocation5 + $0x70] sm:$0xff]  ;;  %v929_v35 = vpack.c.bf16 %v343_v33, %v342_v32  ;;  %v345_v36 = vld [vmem:[#allocation5 + $0x78] sm:$0xff]  ;;  %v780_v48 = vld [vmem:[#allocation7] ss:$0 sm:$0xff] }
  0x9d   : > { %v933_v37 = vpack.c.bf16 %v345_v36, %v344_v34  ;;  %v781_v6 = vld [vmem:[#allocation7 + $0x1] ss:$0 sm:$0xff]  ;;  %v782_v9 = vld [vmem:[#allocation7 + $0x2] ss:$0 sm:$0xff]  ;;  %v495_v24 = vld [vmem:[#allocation8 + $0x20] sm:$0xff] }
  0x9e   : > { %v497_v27 = vld [vmem:[#allocation8 + $0x30] sm:$0xff]  ;;  %v785_v12 = vld [vmem:[%s1605_s4 + $0x2] ss:$0 sm:$0xff] }
  0x9f   : > { %912 = vmatpush3.bf16.msra.mxu0 %v909_v7 }
  0xa0   : > { %914 = vmatprep.subr.bf16.mxu0 %v913_v10 }
  0xa3   : > { %916 = vmatpush3.bf16.msra.mxu0 %v913_v10 }
  0xa4   : > { %918 = vmatprep.subr.bf16.mxu0 %v917_v25 }
  0xa7   : > { %920 = vmatpush3.bf16.msra.mxu0 %v917_v25  ;;  %v496_v25 = vld [vmem:[#allocation8 + $0x28] sm:$0xff] }
  0xa8   : > { %922 = vmatprep.subr.bf16.mxu0 %v921_v28  ;;  %v945_v26 = vpack.c.bf16 %v496_v25, %v495_v24 }
  0xab   : > { %924 = vmatpush3.bf16.msra.mxu0 %v921_v28  ;;  %v498_v28 = vld [vmem:[#allocation8 + $0x38] sm:$0xff] }
  0xac   : > { %926 = vmatprep.subr.bf16.mxu0 %v925_v31  ;;  %v949_v29 = vpack.c.bf16 %v498_v28, %v497_v27 }
  0xaf   : > { %928 = vmatpush3.bf16.msra.mxu0 %v925_v31 }
  0xb0   : > { %930 = vmatprep.subr.bf16.mxu0 %v929_v35 }
  0xb3   : > { %932 = vmatpush3.bf16.msra.mxu0 %v929_v35 }
  0xb4   : > { %934 = vmatprep.subr.bf16.mxu0 %v933_v37 }
  0xb7   : > { %936 = vmatpush3.bf16.msra.mxu0 %v933_v37 }
 0x124   : > { %v304_v13 = vpop.xlane.xlu0 %303 }
 0x125   : > { %v307_v14 = vmul.f32 0.015625, %v304_v13 }
 0x127   : > { %v309_v15 = vsub.f32 %v301_v0, %v307_v14 }
 0x128   : > { %v306_v16 = vpop.xlane.xlu0 %305 }
 0x129   : > { %v308_v17 = vmul.f32 0.015625, %v306_v16  ;;  %v314_v18 = vsel %vm313_vm0, %v309_v15, 0.0 }
 0x12a   : > { %v316_v19 = vmul.f32 %v314_v18, %v314_v18 }
 0x12b   : > { %v310_v20 = vsub.f32 %v302_v1, %v308_v17 }
 0x12c   : > { %318 = vadd.xlane.f32.xlu1 %v316_v19  ;;  %v492_v19 = vld [vmem:[#allocation8 + $0x8] sm:$0xff] }
 0x12d   : > { %v315_v21 = vsel %vm313_vm0, %v310_v20, 0.0  ;;  %v493_v20 = vld [vmem:[#allocation8 + $0x10] sm:$0xff] }
 0x12e   : > { %v317_v22 = vmul.f32 %v315_v21, %v315_v21 }
 0x130   : > { %320 = vadd.xlane.f32.xlu1 %v317_v22  ;;  %v494_v22 = vld [vmem:[#allocation8 + $0x18] sm:$0xff] }
 0x131   : > { %v941_v23 = vpack.c.bf16 %v494_v22, %v493_v20 }
 0x1b9   : > { %v319_v38 = vpop.xlane.xlu1 %318 }
 0x1ba   : > { %v322_v39 = vmul.f32 0.015625, %v319_v38 }
 0x1bc   : > { %v324_v40 = vadd.f32 1e-05, %v322_v39 }
 0x1bd   : > { %v321_v41 = vpop.xlane.xlu1 %320 }
 0x1be   : > { %1045 = vrsqrt.f32 %v324_v40  ;;  %v323_v42 = vmul.f32 0.015625, %v321_v41  ;;  %v499_v40 = vld [vmem:[#allocation8 + $0x40] sm:$0xff]  ;;  %v500_v41 = vld [vmem:[#allocation8 + $0x48] sm:$0xff] }
 0x1c0   : > { %v325_v43 = vadd.f32 1e-05, %v323_v42  ;;  %v953_v42 = vpack.c.bf16 %v500_v41, %v499_v40 }
 0x1c2   : > { %1047 = vrsqrt.f32 %v325_v43  ;;  %v501_v43 = vld [vmem:[#allocation8 + $0x50] sm:$0xff] }
 0x1c8   : > { %v1046_v44 = vpop.eup %1045 }
 0x1c9   : > { %v328_v45 = vmul.f32 %v1046_v44, %v314_v18  ;;  %v491_v18 = vld [vmem:[#allocation8] sm:$0xff]  ;;  %v502_v44 = vld [vmem:[#allocation8 + $0x58] sm:$0xff] }
 0x1cb   : > { %867 = vmatprep.mubr.f32.mxu0 %v328_v45  ;;  %v957_v45 = vpack.c.bf16 %v502_v44, %v501_v43 }
 0x1cc   : > { %v1048_v46 = vpop.eup %1047 }
 0x1cd   : > { %v329_v47 = vmul.f32 %v1048_v46, %v315_v21  ;;  %v937_v21 = vpack.c.bf16 %v492_v19, %v491_v18  ;;  %v503_v46 = vld [vmem:[#allocation8 + $0x60] sm:$0xff] }
 0x1cf   : > { %868 = vmatmul.mubr.f32.vlgmr.msra.gmra.mrb[0].mxu0 %v329_v47  ;;  %938 = vmatprep.subr.bf16.mxu1 %v937_v21  ;;  %v504_v47 = vld [vmem:[#allocation8 + $0x68] sm:$0xff] }
 0x1d0   : > { %940 = vmatpush3.bf16.msra.mxu1 %v937_v21  ;;  %v784_v21 = vld [vmem:[%s1605_s4 + $0x1] ss:$0 sm:$0xff] }
 0x1d1   : > { %942 = vmatprep.subr.bf16.mxu1 %v941_v23 }
 0x1d4   : > { %944 = vmatpush3.bf16.msra.mxu1 %v941_v23 }
 0x1d5   : > { %946 = vmatprep.subr.bf16.mxu1 %v945_v26 }
 0x1d8   : > { %948 = vmatpush3.bf16.msra.mxu1 %v945_v26 }
 0x1d9   : > { %950 = vmatprep.subr.bf16.mxu1 %v949_v29 }
 0x1dc   : > { %952 = vmatpush3.bf16.msra.mxu1 %v949_v29 }
 0x1dd   : > { %954 = vmatprep.subr.bf16.mxu1 %v953_v42 }
 0x1e0   : > { %956 = vmatpush3.bf16.msra.mxu1 %v953_v42 }
 0x1e1   : > { %958 = vmatprep.subr.bf16.mxu1 %v957_v45 }
 0x1e4   : > { %960 = vmatpush3.bf16.msra.mxu1 %v957_v45 }
 0x2a2   : > { %v869_v49 = vpop.f32.mrb[0].mxu0 }
 0x2a3   : > { %v423_v50 = vadd.f32 %v869_v49, %v780_v48  ;;  %v417_v51 = vpop.f32.mrb[1].mxu0  ;;  %v505_v49 = vld [vmem:[#allocation8 + $0x70] sm:$0xff] }
 0x2a4   : > { %v418_v52 = vadd.f32 %v780_v48, %v417_v51  ;;  %v961_v48 = vpack.c.bf16 %v504_v47, %v503_v46 }
 0x2a5   : > { %428 = vadd.xlane.f32.xlu1 %v423_v50 }
 0x2a6   : > { %426 = vadd.xlane.f32.xlu0 %v418_v52  ;;  %962 = vmatprep.subr.bf16.mxu1 %v961_v48 }
 0x2a7   : > { %964 = vmatpush3.bf16.msra.mxu1 %v961_v48 }
 0x332   : > { %v429_v53 = vpop.xlane.xlu1 %428 }
 0x333   : > { %v431_v54 = vmul.f32 0.03125, %v429_v53  ;;  %v427_v55 = vpop.xlane.xlu0 %426 }
 0x334   : > { %v430_v56 = vmul.f32 0.03125, %v427_v55 }
 0x335   : > { %v433_v57 = vsub.f32 %v423_v50, %v431_v54  ;;  %v506_v50 = vld [vmem:[#allocation8 + $0x78] sm:$0xff] }
 0x336   : > { %v432_v58 = vsub.f32 %v418_v52, %v430_v56  ;;  %v965_v51 = vpack.c.bf16 %v506_v50, %v505_v49 }
 0x337   : > { %v436_v59 = vsel %vm434_vm1, %v433_v57, 0.0 }
 0x338   : > { %v438_v60 = vmul.f32 %v436_v59, %v436_v59  ;;  %v435_v61 = vsel %vm434_vm1, %v432_v58, 0.0  ;;  %966 = vmatprep.subr.bf16.mxu1 %v965_v51 }
 0x339   : > { %v437_v62 = vmul.f32 %v435_v61, %v435_v61  ;;  %968 = vmatpush3.bf16.msra.mxu1 %v965_v51 }
 0x33a   : > { %441 = vadd.xlane.f32.xlu1 %v438_v60 }
 0x33b   : > { %439 = vadd.xlane.f32.xlu0 %v437_v62  ;;  %v783_v62 = vld [vmem:[%s1605_s4] ss:$0 sm:$0xff] }
 0x3c7   : > { %v442_v63 = vpop.xlane.xlu1 %441 }
 0x3c8   : > { %v444_v0 = vmul.f32 0.03125, %v442_v63  ;;  %v440_v1 = vpop.xlane.xlu0 %439 }
 0x3c9   : > { %v443_v2 = vmul.f32 0.03125, %v440_v1 }
 0x3ca   : > { %v446_v3 = vadd.f32 1e-05, %v444_v0 }
 0x3cb   : > { %v445_v4 = vadd.f32 1e-05, %v443_v2 }
 0x3cc   : > { %1049 = vrsqrt.f32 %v446_v3 }
 0x3cd   : > { %1051 = vrsqrt.f32 %v445_v4 }
 0x3d6   : > { %v1050_v5 = vpop.eup %1049 }
 0x3d7   : > { %v1052_v7 = vpop.eup %1051  ;;  %v450_v8 = vmul.f32 %v1050_v5, %v436_v59 }
 0x3d8   : > { %v449_v10 = vmul.f32 %v1052_v7, %v435_v61 }
 0x3d9   : > { %v457_v11 = vmul.f32 %v781_v6, %v450_v8 }
 0x3da   : > { %v456_v13 = vmul.f32 %v781_v6, %v449_v10 }
 0x3db   : > { %v464_v14 = vadd.f32 %v782_v9, %v457_v11 }
 0x3dc   : > { %v463_v15 = vadd.f32 %v782_v9, %v456_v13 }
 0x3dd   : > { %v466_v16 = vmax.f32 %v464_v14, 0.0 }
 0x3de   : > { %v465_v17 = vmax.f32 %v463_v15, 0.0 }
 0x3df   : > { %469 = vadd.xlane.f32.xlu1 %v466_v16 }
 0x3e0   : > { %467 = vadd.xlane.f32.xlu0 %v465_v17 }
 0x46c   : > { %v470_v30 = vpop.xlane.xlu1 %469 }
 0x46d   : > { %v472_v31 = vmul.f32 0.03125, %v470_v30  ;;  %v468_v32 = vpop.xlane.xlu0 %467 }
 0x46e   : > { %v471_v33 = vmul.f32 0.03125, %v468_v32 }
 0x46f   : > { %v474_v34 = vsub.f32 %v466_v16, %v472_v31 }
 0x470   : > { %v473_v35 = vsub.f32 %v465_v17, %v471_v33 }
 0x471   : > { %v476_v36 = vsel %vm434_vm1, %v474_v34, 0.0 }
 0x472   : > { %v478_v37 = vmul.f32 %v476_v36, %v476_v36  ;;  %v475_v38 = vsel %vm434_vm1, %v473_v35, 0.0 }
 0x473   : > { %v477_v39 = vmul.f32 %v475_v38, %v475_v38 }
 0x474   : > { %481 = vadd.xlane.f32.xlu1 %v478_v37 }
 0x475   : > { %479 = vadd.xlane.f32.xlu0 %v477_v39 }
 0x501   : > { %v482_v52 = vpop.xlane.xlu1 %481 }
 0x502   : > { %v484_v53 = vmul.f32 0.03125, %v482_v52  ;;  %v480_v54 = vpop.xlane.xlu0 %479 }
 0x503   : > { %v483_v55 = vmul.f32 0.03125, %v480_v54 }
 0x504   : > { %v486_v56 = vadd.f32 1e-05, %v484_v53 }
 0x505   : > { %v485_v57 = vadd.f32 1e-05, %v483_v55 }
 0x506   : > { %1053 = vrsqrt.f32 %v486_v56 }
 0x507   : > { %1055 = vrsqrt.f32 %v485_v57 }
 0x510   : > { %v1054_v58 = vpop.eup %1053 }
 0x511   : > { %v1056_v59 = vpop.eup %1055  ;;  %v490_v61 = vmul.f32 %v1054_v58, %v476_v36 }
 0x512   : > { %v489_v60 = vmul.f32 %v1056_v59, %v475_v38 }
 0x514   : > { %902 = vmatprep.mubr.f32.mxu1 %v489_v60 }
 0x515   : > { %903 = vmatmul.mubr.f32.vlgmr.msra.gmra.mrb[0].mxu1 %v490_v61 }
 0x5e8   : > { %v904_v63 = vpop.f32.mrb[0].mxu1 }
 0x5e9   : > { %v584_v0 = vadd.f32 %v904_v63, %v783_v62  ;;  %v578_v1 = vpop.f32.mrb[1].mxu1 }
 0x5ea   : > { %v579_v2 = vadd.f32 %v783_v62, %v578_v1 }
 0x5eb   : > { %589 = vadd.xlane.f32.xlu1 %v584_v0 }
 0x5ec   : > { %587 = vadd.xlane.f32.xlu0 %v579_v2 }
 0x678   : > { %v590_v3 = vpop.xlane.xlu1 %589 }
 0x679   : > { %v592_v4 = vmul.f32 0.015625, %v590_v3  ;;  %v588_v5 = vpop.xlane.xlu0 %587 }
 0x67a   : > { %v591_v6 = vmul.f32 0.015625, %v588_v5 }
 0x67b   : > { %v594_v7 = vsub.f32 %v584_v0, %v592_v4 }
 0x67c   : > { %v593_v8 = vsub.f32 %v579_v2, %v591_v6 }
 0x67d   : > { %v596_v9 = vsel %vm313_vm0, %v594_v7, 0.0 }
 0x67e   : > { %v598_v10 = vmul.f32 %v596_v9, %v596_v9  ;;  %v595_v11 = vsel %vm313_vm0, %v593_v8, 0.0 }
 0x67f   : > { %v597_v13 = vmul.f32 %v595_v11, %v595_v11 }
 0x680   : > { %601 = vadd.xlane.f32.xlu1 %v598_v10 }
 0x681   : > { %599 = vadd.xlane.f32.xlu0 %v597_v13 }
 0x70d   : > { %v602_v14 = vpop.xlane.xlu1 %601 }
 0x70e   : > { %v604_v15 = vmul.f32 0.015625, %v602_v14  ;;  %v600_v16 = vpop.xlane.xlu0 %599 }
 0x70f   : > { %v603_v17 = vmul.f32 0.015625, %v600_v16 }
 0x710   : > { %v606_v18 = vadd.f32 1e-05, %v604_v15 }
 0x711   : > { %v605_v19 = vadd.f32 1e-05, %v603_v17 }
 0x712   : > { %1057 = vrsqrt.f32 %v606_v18 }
 0x713   : > { %1059 = vrsqrt.f32 %v605_v19 }
 0x71c   : > { %v1058_v20 = vpop.eup %1057 }
 0x71d   : > { %v1060_v22 = vpop.eup %1059  ;;  %v610_v23 = vmul.f32 %v1058_v20, %v596_v9 }
 0x71e   : > { %v609_v24 = vmul.f32 %v1060_v22, %v595_v11 }
 0x71f   : > { %v617_v25 = vmul.f32 %v784_v21, %v610_v23 }
 0x720   : > { %v616_v26 = vmul.f32 %v784_v21, %v609_v24 }
 0x721   : > { %v624_v27 = vadd.f32 %v785_v12, %v617_v25 }
 0x722   : > { %v623_v28 = vadd.f32 %v785_v12, %v616_v26 }
 0x723   : > { %v787_v29 = vmul.f32 -1.442695, %v624_v27 }
 0x724   : > { %v786_v30 = vmul.f32 -1.442695, %v623_v28 }
 0x725   : > { %1061 = vpow2.f32 %v787_v29 }
 0x726   : > { %1063 = vpow2.f32 %v786_v30 }
 0x72f   : > { %v1062_v31 = vpop.eup %1061 }
 0x730   : > { %v1064_v32 = vpop.eup %1063  ;;  %v632_v33 = vadd.f32 1.0, %v1062_v31 }
 0x731   : > { %v631_v34 = vadd.f32 1.0, %v1064_v32 }
 0x732   : > { %1065 = vrcp.f32 %v632_v33 }
 0x733   : > { %1067 = vrcp.f32 %v631_v34 }
 0x738   : > { %646 = sbr.rel (!%p1630_p10) target bundleno = 1883 (0x75b), region = 60 }
 0x73c   : > { %v1066_v35 = vpop.eup %1065 }
 0x73d   : > { %v1068_v36 = vpop.eup %1067  ;;  %638 = vst [vmem:[%s290_s14 + $0x8] sm:$0xff] %v1066_v35 }
 0x73e   : > { %637 = vst [vmem:[%s290_s14] sm:$0xff] %v1068_v36 }
 0x73f   : > { %s1640_s25 = smov (!%p649_p1, %s648_s25), 2 }
 0x740   : > { %s1544_s13 = sshll.u32 %s1640_s25, 7 }
 0x741   : > { %s653_s28 = ssub.s32 256, %s1544_s13 }
 0x742   : > { %654 = vsyncadd %s640_s16, %s653_s28  ;;  %p791_p4 = scmp.ne.s32.totalorder %s1544_s13, 0  ;;  %s798_s15 = sshll.u32 %s1319_s22, 8 }
 0x743   : > { %s1554_s11 = scalar_lea.hbm %s1606_s5, %s798_s15  ;;  %s659_s27 = sshll.u32 %s290_s14, 4  ;;  %s1556_s27 = int_to_ptr.vmem [resolvable:$true] %s659_s27 }
 0x744   : > { %s1181_s23 = scalar_lea.vmem %s1556_s27, %s1544_s13  ;;  %s1265_s29 = smov [#allocation10]  }
 0x745   : > { %p1182_p3 = scmp.ne.s32.totalorder %s1556_s27, %s1181_s23  ;;  %s1185_s7 = sshll.u32 %s1265_s29, 4  ;;  %s1186_s7 = int_to_ptr.vmem [resolvable:$false] %s1185_s7 }
 0x746   : > { %s1187_s22 = scalar_lea.vmem %s1186_s7, 512  ;;  %p1188_p11 = scmp.lt.s32.totalorder %s1556_s27, %s1186_s7 }
 0x747   : > { %p1183_p5 = pnand %p1182_p3, %p791_p4  ;;  %p1189_p13 = scmp.lt.s32.totalorder %s1187_s22, %s1181_s23 }
 0x749   : > { %p1184_p6 = pneg %p1183_p5  ;;  %p1190_p12 = por %p1189_p13, %p1188_p11 }
 0x74b   : > { %p1191_p0 = pnand %p1190_p12, %p1184_p6 }
 0x74d   : > { %1194 = shalt.err (!%p1191_p0)
}
 0x74e   : > { %s1195_s10 = scalar_lea.hbm %s1554_s11, %s1544_s13  ;;  %s1199_s12 = scalar_lea.hbm %s1606_s5, 896 }
 0x74f   : > { %p1196_p2 = scmp.ne.s32.totalorder %s1554_s11, %s1195_s10  ;;  %p1200_p9 = scmp.lt.u32.totalorder %s1554_s11, %s1606_s5 }
 0x750   : > { %p1201_p10 = scmp.lt.u32.totalorder %s1199_s12, %s1195_s10  ;;  %p1203_p3 = scmp.lt.u32.totalorder %s1195_s10, %s1554_s11 }
 0x751   : > { %p1197_p7 = pnand %p1196_p2, %p791_p4 }
 0x752   : > { %p1202_p1 = por %p1201_p10, %p1200_p9 }
 0x753   : > { %p1198_p8 = pneg %p1197_p7 }
 0x754   : > { %p1204_p5 = por %p1203_p3, %p1202_p1 }
 0x756   : > { %p1205_p6 = pnand %p1204_p5, %p1198_p8 }
 0x758   : > { %1208 = shalt.err (!%p1205_p6)
}
 0x759   : > { %s1266_s25 = smov 128   ;;  %s1267_s28 = smov 8  }
 0x75a   : > { %665 = dma.vmem_to_hbm [thread:$0]  (%p791_p4), %s1556_s27, %s1544_s13, %s1554_s11, %s640_s16, %s1266_s25, %s1266_s25, %s1267_s28  }
 0x75b PF: > { %p1003_p11 = scmp.ge.s32.totalorder %s1255_s21, 2  ;;  %s674_s15 = sand.u32 1, %s1243_s18  }
 0x75c   : > { %p1631_p13 = scmp.ne.s32.totalorder %s1618_s6, 0  ;;  %s675_s30 = scalar_lea.sflag [#allocation4], %s674_s15 }
 0x75e   : > { %p994_p12 = pnand %p1003_p11, %p1631_p13 }
 0x760   : > { %1238 = dma.done.wait (!%p994_p12), %s675_s30, 256  }
 0x761   : > { %1240 = vsyncadd (!%p994_p12), %s675_s30, 4294967040  ;;  %s1632_s21 = sld [smem:[#allocation15_spill]]  ;;  %s1633_s8 = sld [smem:[#allocation16_spill]] }
 0x762   : > { %s1634_s18 = smov %s1247_s19  ;;  %s1635_s19 = smov %s1251_s20 }
 0x767   : > { %p20_p0 = scmp.ge.s32.totalorder %s1632_s21, 6   ;;  %s1636_s20 = smov %s1633_s8 }
 0x769   :  { %22 = sbr.rel (!%p20_p0) target bundleno = 7 (0x7), region = 97 }
 0x770   :  { %680 = vsyncpa [#allocation3], 1 }
 0x771   :  { %682 = vsyncpa [#allocation3 + $0x1], 1 }
 0x772   :  { %683 = vsyncpa [#allocation6], 1 }
 0x773   :  { %684 = vsyncpa [#allocation9], 1 }
 0x774   :  { %685 = vsyncpa [#allocation4], 1 }
 0x775   :  { %687 = vsyncpa [#allocation4 + $0x1], 1 }

// kernel: tpu_custom_call.1
= control target key start
LH: loop header
LB: loop body
LE: loop exit
PB: predicated region body
PF: predicated region fallthrough
CT: control target
= control target key end

     0   :  { %10 = vsyncpa [#allocation3], 0  ;;  %s1601_s0 = inlined_call_operand.hbm [shape: f32[50,128], index: 0, kind: input, shape index: {}]   ;;  %s1602_s1 = inlined_call_operand.hbm [shape: f32[128,128], index: 1, kind: input, shape index: {}]   ;;  %s1603_s2 = inlined_call_operand.hbm [shape: f32[8,128], index: 2, kind: input, shape index: {}]   ;;  %s1604_s3 = inlined_call_operand.hbm [shape: f32[128,128], index: 3, kind: input, shape index: {}]   ;;  %s1605_s4 = inlined_call_operand.vmem [shape: f32[8,128], index: 4, kind: input, shape index: {}]   ;;  %s1606_s5 = inlined_call_operand.hbm [shape: f32[50,128], index: 5, kind: output, shape index: {}]  }
   0x1   :  { %12 = vsyncpa [#allocation3 + $0x1], 0 }
   0x2   :  { %13 = vsyncpa [#allocation6], 0 }
   0x3   :  { %14 = vsyncpa [#allocation9], 0 }
   0x4   :  { %15 = vsyncpa [#allocation4], 0 }
   0x5   :  { %17 = vsyncpa [#allocation4 + $0x1], 0  ;;  %s1298_s18 = smov 0   ;;  %s1300_s19 = smov 0  }
   0x6   :  { %s1302_s20 = smov 0   ;;  %s1304_s21 = smov 0  }
   0x7 LB: > { %s1319_s22 = sadd.s32 4294967295, %s1255_s21   ;;  %s761_s23 = sadd.s32 4294967294, %s1255_s21   ;;  %s1255_s21 = sphi %s1304_s21, %s1632_s21   ;;  %s1251_s20 = sphi %s1302_s20, %s1636_s20   ;;  %s1247_s19 = sphi %s1300_s19, %s1635_s19   ;;  %s1243_s18 = sphi %s1298_s18, %s1634_s18  }
   0x8   : > { %s1323_s24 = sadd.s32 1, %s1255_s21   ;;  %s30_s25 = sadd.s32 1, %s1251_s20 }
   0x9   : > { %1613 = sst [smem:[#allocation15_spill]] %s1323_s24  ;;  %s27_s26 = ssub.s32 %s1255_s21, %s1323_s24 }
   0xa   : > { %p37_p0 = scmp.ne.s32.totalorder %s1251_s20, %s1247_s19  ;;  %p28_p1 = scmp.eq.s32.totalorder %s27_s26, 0 }
   0xb   : > { %p38_p2 = scmp.eq.s32.totalorder %s1255_s21, 0  ;;  %p43_p3 = scmp.ne.s32.totalorder %s1247_s19, %s1243_s18 }
   0xc   : > { %p1607_p4 = scmp.eq.s32.totalorder %s1319_s22, 0  ;;  %p151_p7 = scmp.eq.s32.totalorder %s1319_s22, 3 }
   0xd   : > { %s1335_s27 = scalar_select %p28_p1, %s1251_s20, %s30_s25  }
   0xe   : > { %p1337_p5 = por %p38_p2, %p37_p0  ;;  %p1343_p6 = por %p1607_p4, %p43_p3 }
   0xf   : > { %1614 = sst [smem:[#allocation16_spill]] %s1335_s27  ;;  %p157_p8 = scmp.eq.s32.totalorder %s761_s23, 3 }
  0x10   : > { %s1615_s28 = scalar_select %p1337_p5, 1, 0 }
  0x11   : > { %s1616_s29 = scalar_select %p1343_p6, 1, 0 }
  0x12   : > { %p762_p9 = scmp.ge.s32.totalorder %s1255_s21, 1  ;;  %p164_p10 = scmp.lt.s32.totalorder %s1255_s21, 5 }
  0x13   : > { %p1350_p11 = por %p151_p7, %p37_p0  ;;  %p1354_p12 = por %p157_p8, %p43_p3 }
  0x14   : > { %p1358_p13 = pnand %p762_p9, %p164_p10  ;;  %s1257_s8 = smov [#allocation5]  }
  0x15   : > { %s1617_s30 = scalar_select %p1350_p11, 1, 0 }
  0x16   : > { %s1618_s6 = scalar_select %p1354_p12, 1, 0 }
  0x17   : > { %s1619_s7 = scalar_select %p1358_p13, 1, 0 }
  0x18   : > { %p983_p1 = pneg %p1358_p13  ;;  %s176_s9 = sshll.u32 %s1257_s8, 4  ;;  %s177_s9 = int_to_ptr.vmem [resolvable:$true] %s176_s9 }
  0x19   : > { %s1258_s11 = smov [#allocation7]   ;;  %s1069_s15 = scalar_lea.hbm %s1602_s1, 2048 }
  0x1a   : > { %p1366_p2 = pnand %p983_p1, %p1607_p4  ;;  %s190_s12 = sshll.u32 %s1258_s11, 4  ;;  %s1370_s12 = int_to_ptr.vmem [resolvable:$true] %s190_s12 }
  0x1b   : > { %p1070_p0 = scmp.ne.s32.totalorder %s1602_s1, %s1069_s15  ;;  %p1076_p9 = scmp.lt.u32.totalorder %s1069_s15, %s1602_s1 }
  0x1c   : > { %p1380_p3 = pneg %p1366_p2 }
  0x1e   : > { %p1072_p7 = pnand %p1380_p3, %p1070_p0 }
  0x20   : > { %p1073_p8 = pneg %p1072_p7 }
  0x22   : > { %p1078_p10 = pnand %p1076_p9, %p1073_p8 }
  0x24   : > { %1081 = shalt.err (!%p1078_p10)
}
  0x25   : > { %s1082_s8 = scalar_lea.vmem %s177_s9, 2048  ;;  %p1090_p11 = scmp.lt.s32.totalorder %s177_s9, %s177_s9 }
  0x26   : > { %p1083_p1 = scmp.ne.s32.totalorder %s177_s9, %s1082_s8  ;;  %p1091_p6 = scmp.lt.s32.totalorder %s1082_s8, %s1082_s8 }
  0x28   : > { %p1085_p4 = pnand %p1083_p1, %p1380_p3  ;;  %p1092_p13 = por %p1091_p6, %p1090_p11 }
  0x2a   : > { %p1086_p12 = pneg %p1085_p4 }
  0x2c   : > { %p1093_p5 = pnand %p1092_p13, %p1086_p12 }
  0x2e   : > { %1096 = shalt.err (!%p1093_p5)
}
  0x2f   : > { %s1612_s11 = smov 128   ;;  %s1260_s13 = smov 8  }
  0x30   : > { %986 = dma.hbm_to_vmem [thread:$0]  (!%p1366_p2), %s1602_s1, 2048, %s177_s9, [#allocation6], %s1612_s11, %s1612_s11, %s1260_s13  }
  0x31   : > { %s1097_s25 = scalar_lea.hbm %s1603_s2, 128 }
  0x32   : > { %p1098_p4 = scmp.ne.s32.totalorder %s1603_s2, %s1097_s25  ;;  %p1104_p11 = scmp.lt.u32.totalorder %s1097_s25, %s1603_s2 }
  0x34   : > { %p1100_p5 = pnand %p1098_p4, %p1380_p3 }
  0x36   : > { %p1101_p6 = pneg %p1100_p5 }
  0x38   : > { %p1106_p12 = pnand %p1104_p11, %p1101_p6 }
  0x3a   : > { %1109 = shalt.err (!%p1106_p12)
}
  0x3b   : > { %s1110_s9 = scalar_lea.vmem %s1370_s12, 128  ;;  %p1118_p8 = scmp.lt.s32.totalorder %s1370_s12, %s1370_s12 }
  0x3c   : > { %p1111_p13 = scmp.ne.s32.totalorder %s1370_s12, %s1110_s9  ;;  %p1119_p9 = scmp.lt.s32.totalorder %s1110_s9, %s1110_s9 }
  0x3e   : > { %p1113_p0 = pnand %p1111_p13, %p1380_p3  ;;  %p1120_p10 = por %p1119_p9, %p1118_p8 }
  0x40   : > { %p1114_p7 = pneg %p1113_p0 }
  0x42   : > { %p1121_p1 = pnand %p1120_p10, %p1114_p7 }
  0x44   : > { %1124 = shalt.err (!%p1121_p1)
}
  0x45   : > { %989 = dma.hbm_to_vmem [thread:$0]  (!%p1366_p2), %s1603_s2, 128, %s1370_s12, [#allocation6]  }
  0x46   : > { %s1261_s14 = smov [#allocation8]   ;;  %s1125_s25 = scalar_lea.hbm %s1604_s3, 2048 }
  0x47   : > { %s200_s15 = sshll.u32 %s1261_s14, 4  ;;  %p1126_p4 = scmp.ne.s32.totalorder %s1604_s3, %s1125_s25  ;;  %s201_s15 = int_to_ptr.vmem [resolvable:$true] %s200_s15 }
  0x48   : > { %p1132_p11 = scmp.lt.u32.totalorder %s1125_s25, %s1604_s3 }
  0x49   : > { %p1128_p5 = pnand %p1126_p4, %p1380_p3 }
  0x4b   : > { %p1129_p6 = pneg %p1128_p5 }
  0x4d   : > { %p1134_p12 = pnand %p1132_p11, %p1129_p6 }
  0x4f   : > { %1137 = shalt.err (!%p1134_p12)
}
  0x50   : > { %s1138_s12 = scalar_lea.vmem %s201_s15, 2048  ;;  %p1146_p8 = scmp.lt.s32.totalorder %s201_s15, %s201_s15 }
  0x51   : > { %p1139_p13 = scmp.ne.s32.totalorder %s201_s15, %s1138_s12  ;;  %p1147_p9 = scmp.lt.s32.totalorder %s1138_s12, %s1138_s12 }
  0x53   : > { %p1141_p0 = pnand %p1139_p13, %p1380_p3  ;;  %p1148_p10 = por %p1147_p9, %p1146_p8 }
  0x55   : > { %p1142_p7 = pneg %p1141_p0 }
  0x57   : > { %p1149_p1 = pnand %p1148_p10, %p1142_p7 }
  0x59   : > { %1152 = shalt.err (!%p1149_p1)
}
  0x5a   : > { %s1622_s24 = smov 128   ;;  %p766_p4 = scmp.ge.s32.totalorder %s1255_s21, 4 }
  0x5b   : > { %992 = dma.hbm_to_vmem [thread:$0]  (!%p1366_p2), %s1604_s3, 2048, %s201_s15, [#allocation9], %s1622_s24, %s1622_s24, %s1260_s13  }
  0x5c   : > { %213 = sbr.rel (%p766_p4) target bundleno = 134 (0x86), region = 32  ;;  %p1623_p3 = scmp.ne.s32.totalorder (!%p766_p4), %s1615_s28, 0 }
  0x63   : > { %216 = sbr.rel (!%p1623_p3) target bundleno = 134 (0x86), region = 36  ;;  %s217_s23 = sand.u32 (%p1623_p3), 1, %s1251_s20  }
  0x64   : > { %s768_s14 = sshll.u32 (%p1623_p3), %s1255_s21, 1  ;;  %s767_s16 = sshll.u32 (%p1623_p3), %s217_s23, 4 }
  0x65   : > { %s223_s17 = ssub.s32 (%p1623_p3), 7, %s768_s14  ;;  %s1451_s26 = scalar_lea.sflag (%p1623_p3), [#allocation3], %s217_s23 }
  0x66   : > { %p224_p5 = scmp.lt.s32.totalorder (%p1623_p3), %s223_s17, 2  ;;  %s221_s13 = scalar_lea.vmem (%p1623_p3), [#allocation2], %s767_s16 }
  0x6a   : > { %s1638_s17 = smov (!%p224_p5, %s223_s17), 2 }
  0x6b   : > { %s1448_s10 = sshll.u32 %s1638_s17, 7 }
  0x6c   : > { %s228_s25 = ssub.s32 256, %s1448_s10 }
  0x6d   : > { %229 = vsyncadd %s1451_s26, %s228_s25  ;;  %p770_p2 = scmp.ne.s32.totalorder %s1448_s10, 0  ;;  %s797_s28 = sshll.u32 %s1255_s21, 8 }
  0x6e   : > { %s1459_s9 = scalar_lea.hbm %s1601_s0, %s797_s28  ;;  %s234_s12 = sshll.u32 %s221_s13, 4  ;;  %s1461_s12 = int_to_ptr.vmem [resolvable:$true] %s234_s12 }
  0x6f   : > { %s1153_s24 = scalar_lea.hbm %s1459_s9, %s1448_s10  ;;  %s1157_s23 = scalar_lea.hbm %s1601_s0, 896 }
  0x70   : > { %p1154_p6 = scmp.ne.s32.totalorder %s1459_s9, %s1153_s24  ;;  %p1158_p13 = scmp.lt.u32.totalorder %s1459_s9, %s1601_s0 }
  0x71   : > { %p1159_p0 = scmp.lt.u32.totalorder %s1157_s23, %s1153_s24  ;;  %p1161_p8 = scmp.lt.u32.totalorder %s1153_s24, %s1459_s9 }
  0x72   : > { %p1155_p11 = pnand %p1154_p6, %p770_p2 }
  0x73   : > { %p1160_p7 = por %p1159_p0, %p1158_p13 }
  0x74   : > { %p1156_p12 = pneg %p1155_p11 }
  0x75   : > { %p1162_p9 = por %p1161_p8, %p1160_p7 }
  0x77   : > { %p1163_p10 = pnand %p1162_p9, %p1156_p12 }
  0x79   : > { %1166 = shalt.err (!%p1163_p10)
}
  0x7a   : > { %s1167_s17 = scalar_lea.vmem %s1461_s12, %s1448_s10  ;;  %s1262_s25 = smov [#allocation2]  }
  0x7b   : > { %p1168_p1 = scmp.ne.s32.totalorder %s1461_s12, %s1167_s17  ;;  %s1171_s13 = sshll.u32 %s1262_s25, 4  ;;  %s1172_s13 = int_to_ptr.vmem [resolvable:$false] %s1171_s13 }
  0x7c   : > { %s1173_s28 = scalar_lea.vmem %s1172_s13, 512  ;;  %p1174_p5 = scmp.lt.s32.totalorder %s1461_s12, %s1172_s13 }
  0x7d   : > { %p1169_p4 = pnand %p1168_p1, %p770_p2  ;;  %p1175_p6 = scmp.lt.s32.totalorder %s1173_s28, %s1167_s17 }
  0x7f   : > { %p1170_p3 = pneg %p1169_p4  ;;  %p1176_p11 = por %p1175_p6, %p1174_p5 }
  0x81   : > { %p1177_p13 = pnand %p1176_p11, %p1170_p3 }
  0x83   : > { %1180 = shalt.err (!%p1177_p13)
}
  0x84   : > { %s1263_s15 = smov 128   ;;  %s1264_s8 = smov 8  }
  0x85   : > { %240 = dma.hbm_to_vmem [thread:$0]  (%p770_p2), %s1459_s9, %s1448_s10, %s1461_s12, %s1451_s26, %s1263_s15, %s1263_s15, %s1264_s8  }
  0x86 PF: > { %p1624_p12 = scmp.ne.s32.totalorder %s1619_s7, 0 }
  0x87   : > { %s1491_s24 = sand.u32 (!%p1624_p12), 1, %s1247_s19   ;;  %p1625_p0 = scmp.ne.s32.totalorder (!%p1624_p12), %s1616_s29, 0 }
  0x88   : > { %246 = sbr.rel (%p1624_p12) target bundleno = 1883 (0x75b), region = 40  ;;  %s775_s11 = sshll.u32 (!%p1624_p12), %s1491_s24, 4 }
  0x89   : > { %s249_s27 = scalar_lea.sflag (!%p1624_p12), [#allocation3], %s1491_s24  ;;  %s252_s23 = scalar_lea.vmem (!%p1624_p12), [#allocation2], %s775_s11 }
  0x8f   : > { %1226 = dma.done.wait (%p1625_p0), %s249_s27, 256  }
  0x90   : > { %1228 = vsyncadd (%p1625_p0), %s249_s27, 4294967040  ;;  %p1626_p2 = scmp.eq.s32.totalorder %s1319_s22, 0 }
  0x92   : > { %1230 = dma.done.wait (%p1626_p2), [#allocation6], 2176   ;;  %p1627_p7 = pmov %p1626_p2 }
  0x93   : > { %p1628_p8 = pmov %p1626_p2 }
  0x94   : > { %1232 = vsyncadd (%p1627_p7), [#allocation6], 4294965120 }
  0x95   : > { %1234 = dma.done.wait (%p1628_p8), [#allocation9], 2048   ;;  %p1629_p9 = pmov %p1626_p2 }
  0x96   : > { %v301_v0 = vld [vmem:[%s252_s23] sm:$0xff]  ;;  %v302_v1 = vld [vmem:[%s252_s23 + $0x8] sm:$0xff]  ;;  %v311_v11 = vlaneseq  ;;  %s290_s14 = scalar_lea.vmem [#allocation10], %s775_s11  ;;  %s640_s16 = scalar_lea.sflag [#allocation4], %s1491_s24 }
  0x97   : > { %1236 = vsyncadd (%p1629_p9), [#allocation9], 4294965248  ;;  %303 = vadd.xlane.f32.xlu0 %v301_v0  ;;  %v330_v2 = vld [vmem:[#allocation5] sm:$0xff]  ;;  %v331_v3 = vld [vmem:[#allocation5 + $0x8] sm:$0xff]  ;;  %p1630_p10 = scmp.ne.s32.totalorder %s1617_s30, 0 }
  0x98   : > { %v332_v4 = vld [vmem:[#allocation5 + $0x10] sm:$0xff]  ;;  %v905_v5 = vpack.c.bf16 %v331_v3, %v330_v2  ;;  %v333_v6 = vld [vmem:[#allocation5 + $0x18] sm:$0xff]  ;;  %v334_v8 = vld [vmem:[#allocation5 + $0x20] sm:$0xff]  ;;  %v1509_v12 = vand.u32 127, %v311_v11  ;;  %s789_s17 = sshll.u32 (%p1630_p10), %s1319_s22, 1 }
  0x99   : > { %v909_v7 = vpack.c.bf16 %v333_v6, %v332_v4  ;;  %v335_v9 = vld [vmem:[#allocation5 + $0x28] sm:$0xff]  ;;  %v336_v23 = vld [vmem:[#allocation5 + $0x30] sm:$0xff]  ;;  %v337_v24 = vld [vmem:[#allocation5 + $0x38] sm:$0xff]  ;;  %s648_s25 = ssub.s32 (%p1630_p10), 7, %s789_s17 }
  0x9a   : > { %906 = vmatprep.subr.bf16.mxu0 %v905_v5  ;;  %v913_v10 = vpack.c.bf16 %v335_v9, %v334_v8  ;;  %vm313_vm0 = vcmp.lt.s32.totalorder %v1509_v12, 64  ;;  %v917_v25 = vpack.c.bf16 %v337_v24, %v336_v23  ;;  %v338_v26 = vld [vmem:[#allocation5 + $0x40] sm:$0xff]  ;;  %v339_v27 = vld [vmem:[#allocation5 + $0x48] sm:$0xff]  ;;  %v340_v29 = vld [vmem:[#allocation5 + $0x50] sm:$0xff]  ;;  %vm434_vm1 = vcmp.lt.s32.totalorder %v1509_v12, 32  ;;  %p649_p1 = scmp.lt.s32.totalorder (%p1630_p10), %s648_s25, 2 }
  0x9b   : > { %305 = vadd.xlane.f32.xlu0 %v302_v1  ;;  %908 = vmatpush3.bf16.msra.mxu0 %v905_v5  ;;  %v921_v28 = vpack.c.bf16 %v339_v27, %v338_v26  ;;  %v341_v30 = vld [vmem:[#allocation5 + $0x58] sm:$0xff]  ;;  %v342_v32 = vld [vmem:[#allocation5 + $0x60] sm:$0xff]  ;;  %v343_v33 = vld [vmem:[#allocation5 + $0x68] sm:$0xff] }
  0x9c   : > { %910 = vmatprep.subr.bf16.mxu0 %v909_v7  ;;  %v925_v31 = vpack.c.bf16 %v341_v30, %v340_v29  ;;  %v344_v34 = vld [vmem:[#allocation5 + $0x70] sm:$0xff]  ;;  %v929_v35 = vpack.c.bf16 %v343_v33, %v342_v32  ;;  %v345_v36 = vld [vmem:[#allocation5 + $0x78] sm:$0xff]  ;;  %v780_v48 = vld [vmem:[#allocation7] ss:$0 sm:$0xff] }
  0x9d   : > { %v933_v37 = vpack.c.bf16 %v345_v36, %v344_v34  ;;  %v781_v6 = vld [vmem:[#allocation7 + $0x1] ss:$0 sm:$0xff]  ;;  %v782_v9 = vld [vmem:[#allocation7 + $0x2] ss:$0 sm:$0xff]  ;;  %v495_v24 = vld [vmem:[#allocation8 + $0x20] sm:$0xff] }
  0x9e   : > { %v497_v27 = vld [vmem:[#allocation8 + $0x30] sm:$0xff]  ;;  %v785_v12 = vld [vmem:[%s1605_s4 + $0x2] ss:$0 sm:$0xff] }
  0x9f   : > { %912 = vmatpush3.bf16.msra.mxu0 %v909_v7 }
  0xa0   : > { %914 = vmatprep.subr.bf16.mxu0 %v913_v10 }
  0xa3   : > { %916 = vmatpush3.bf16.msra.mxu0 %v913_v10 }
  0xa4   : > { %918 = vmatprep.subr.bf16.mxu0 %v917_v25 }
  0xa7   : > { %920 = vmatpush3.bf16.msra.mxu0 %v917_v25  ;;  %v496_v25 = vld [vmem:[#allocation8 + $0x28] sm:$0xff] }
  0xa8   : > { %922 = vmatprep.subr.bf16.mxu0 %v921_v28  ;;  %v945_v26 = vpack.c.bf16 %v496_v25, %v495_v24 }
  0xab   : > { %924 = vmatpush3.bf16.msra.mxu0 %v921_v28  ;;  %v498_v28 = vld [vmem:[#allocation8 + $0x38] sm:$0xff] }
  0xac   : > { %926 = vmatprep.subr.bf16.mxu0 %v925_v31  ;;  %v949_v29 = vpack.c.bf16 %v498_v28, %v497_v27 }
  0xaf   : > { %928 = vmatpush3.bf16.msra.mxu0 %v925_v31 }
  0xb0   : > { %930 = vmatprep.subr.bf16.mxu0 %v929_v35 }
  0xb3   : > { %932 = vmatpush3.bf16.msra.mxu0 %v929_v35 }
  0xb4   : > { %934 = vmatprep.subr.bf16.mxu0 %v933_v37 }
  0xb7   : > { %936 = vmatpush3.bf16.msra.mxu0 %v933_v37 }
 0x124   : > { %v304_v13 = vpop.xlane.xlu0 %303 }
 0x125   : > { %v307_v14 = vmul.f32 0.015625, %v304_v13 }
 0x127   : > { %v309_v15 = vsub.f32 %v301_v0, %v307_v14 }
 0x128   : > { %v306_v16 = vpop.xlane.xlu0 %305 }
 0x129   : > { %v308_v17 = vmul.f32 0.015625, %v306_v16  ;;  %v314_v18 = vsel %vm313_vm0, %v309_v15, 0.0 }
 0x12a   : > { %v316_v19 = vmul.f32 %v314_v18, %v314_v18 }
 0x12b   : > { %v310_v20 = vsub.f32 %v302_v1, %v308_v17 }
 0x12c   : > { %318 = vadd.xlane.f32.xlu1 %v316_v19  ;;  %v492_v19 = vld [vmem:[#allocation8 + $0x8] sm:$0xff] }
 0x12d   : > { %v315_v21 = vsel %vm313_vm0, %v310_v20, 0.0  ;;  %v493_v20 = vld [vmem:[#allocation8 + $0x10] sm:$0xff] }
 0x12e   : > { %v317_v22 = vmul.f32 %v315_v21, %v315_v21 }
 0x130   : > { %320 = vadd.xlane.f32.xlu1 %v317_v22  ;;  %v494_v22 = vld [vmem:[#allocation8 + $0x18] sm:$0xff] }
 0x131   : > { %v941_v23 = vpack.c.bf16 %v494_v22, %v493_v20 }
 0x1b9   : > { %v319_v38 = vpop.xlane.xlu1 %318 }
 0x1ba   : > { %v322_v39 = vmul.f32 0.015625, %v319_v38 }
 0x1bc   : > { %v324_v40 = vadd.f32 1e-05, %v322_v39 }
 0x1bd   : > { %v321_v41 = vpop.xlane.xlu1 %320 }
 0x1be   : > { %1045 = vrsqrt.f32 %v324_v40  ;;  %v323_v42 = vmul.f32 0.015625, %v321_v41  ;;  %v499_v40 = vld [vmem:[#allocation8 + $0x40] sm:$0xff]  ;;  %v500_v41 = vld [vmem:[#allocation8 + $0x48] sm:$0xff] }
 0x1c0   : > { %v325_v43 = vadd.f32 1e-05, %v323_v42  ;;  %v953_v42 = vpack.c.bf16 %v500_v41, %v499_v40 }
 0x1c2   : > { %1047 = vrsqrt.f32 %v325_v43  ;;  %v501_v43 = vld [vmem:[#allocation8 + $0x50] sm:$0xff] }
 0x1c8   : > { %v1046_v44 = vpop.eup %1045 }
 0x1c9   : > { %v328_v45 = vmul.f32 %v1046_v44, %v314_v18  ;;  %v491_v18 = vld [vmem:[#allocation8] sm:$0xff]  ;;  %v502_v44 = vld [vmem:[#allocation8 + $0x58] sm:$0xff] }
 0x1cb   : > { %867 = vmatprep.mubr.f32.mxu0 %v328_v45  ;;  %v957_v45 = vpack.c.bf16 %v502_v44, %v501_v43 }
 0x1cc   : > { %v1048_v46 = vpop.eup %1047 }
 0x1cd   : > { %v329_v47 = vmul.f32 %v1048_v46, %v315_v21  ;;  %v937_v21 = vpack.c.bf16 %v492_v19, %v491_v18  ;;  %v503_v46 = vld [vmem:[#allocation8 + $0x60] sm:$0xff] }
 0x1cf   : > { %868 = vmatmul.mubr.f32.vlgmr.msra.gmra.mrb[0].mxu0 %v329_v47  ;;  %938 = vmatprep.subr.bf16.mxu1 %v937_v21  ;;  %v504_v47 = vld [vmem:[#allocation8 + $0x68] sm:$0xff] }
 0x1d0   : > { %940 = vmatpush3.bf16.msra.mxu1 %v937_v21  ;;  %v784_v21 = vld [vmem:[%s1605_s4 + $0x1] ss:$0 sm:$0xff] }
 0x1d1   : > { %942 = vmatprep.subr.bf16.mxu1 %v941_v23 }
 0x1d4   : > { %944 = vmatpush3.bf16.msra.mxu1 %v941_v23 }
 0x1d5   : > { %946 = vmatprep.subr.bf16.mxu1 %v945_v26 }
 0x1d8   : > { %948 = vmatpush3.bf16.msra.mxu1 %v945_v26 }
 0x1d9   : > { %950 = vmatprep.subr.bf16.mxu1 %v949_v29 }
 0x1dc   : > { %952 = vmatpush3.bf16.msra.mxu1 %v949_v29 }
 0x1dd   : > { %954 = vmatprep.subr.bf16.mxu1 %v953_v42 }
 0x1e0   : > { %956 = vmatpush3.bf16.msra.mxu1 %v953_v42 }
 0x1e1   : > { %958 = vmatprep.subr.bf16.mxu1 %v957_v45 }
 0x1e4   : > { %960 = vmatpush3.bf16.msra.mxu1 %v957_v45 }
 0x2a2   : > { %v869_v49 = vpop.f32.mrb[0].mxu0 }
 0x2a3   : > { %v423_v50 = vadd.f32 %v869_v49, %v780_v48  ;;  %v417_v51 = vpop.f32.mrb[1].mxu0  ;;  %v505_v49 = vld [vmem:[#allocation8 + $0x70] sm:$0xff] }
 0x2a4   : > { %v418_v52 = vadd.f32 %v780_v48, %v417_v51  ;;  %v961_v48 = vpack.c.bf16 %v504_v47, %v503_v46 }
 0x2a5   : > { %428 = vadd.xlane.f32.xlu1 %v423_v50 }
 0x2a6   : > { %426 = vadd.xlane.f32.xlu0 %v418_v52  ;;  %962 = vmatprep.subr.bf16.mxu1 %v961_v48 }
 0x2a7   : > { %964 = vmatpush3.bf16.msra.mxu1 %v961_v48 }
 0x332   : > { %v429_v53 = vpop.xlane.xlu1 %428 }
 0x333   : > { %v431_v54 = vmul.f32 0.03125, %v429_v53  ;;  %v427_v55 = vpop.xlane.xlu0 %426 }
 0x334   : > { %v430_v56 = vmul.f32 0.03125, %v427_v55 }
 0x335   : > { %v433_v57 = vsub.f32 %v423_v50, %v431_v54  ;;  %v506_v50 = vld [vmem:[#allocation8 + $0x78] sm:$0xff] }
 0x336   : > { %v432_v58 = vsub.f32 %v418_v52, %v430_v56  ;;  %v965_v51 = vpack.c.bf16 %v506_v50, %v505_v49 }
 0x337   : > { %v436_v59 = vsel %vm434_vm1, %v433_v57, 0.0 }
 0x338   : > { %v438_v60 = vmul.f32 %v436_v59, %v436_v59  ;;  %v435_v61 = vsel %vm434_vm1, %v432_v58, 0.0  ;;  %966 = vmatprep.subr.bf16.mxu1 %v965_v51 }
 0x339   : > { %v437_v62 = vmul.f32 %v435_v61, %v435_v61  ;;  %968 = vmatpush3.bf16.msra.mxu1 %v965_v51 }
 0x33a   : > { %441 = vadd.xlane.f32.xlu1 %v438_v60 }
 0x33b   : > { %439 = vadd.xlane.f32.xlu0 %v437_v62  ;;  %v783_v62 = vld [vmem:[%s1605_s4] ss:$0 sm:$0xff] }
 0x3c7   : > { %v442_v63 = vpop.xlane.xlu1 %441 }
 0x3c8   : > { %v444_v0 = vmul.f32 0.03125, %v442_v63  ;;  %v440_v1 = vpop.xlane.xlu0 %439 }
 0x3c9   : > { %v443_v2 = vmul.f32 0.03125, %v440_v1 }
 0x3ca   : > { %v446_v3 = vadd.f32 1e-05, %v444_v0 }
 0x3cb   : > { %v445_v4 = vadd.f32 1e-05, %v443_v2 }
 0x3cc   : > { %1049 = vrsqrt.f32 %v446_v3 }
 0x3cd   : > { %1051 = vrsqrt.f32 %v445_v4 }
 0x3d6   : > { %v1050_v5 = vpop.eup %1049 }
 0x3d7   : > { %v1052_v7 = vpop.eup %1051  ;;  %v450_v8 = vmul.f32 %v1050_v5, %v436_v59 }
 0x3d8   : > { %v449_v10 = vmul.f32 %v1052_v7, %v435_v61 }
 0x3d9   : > { %v457_v11 = vmul.f32 %v781_v6, %v450_v8 }
 0x3da   : > { %v456_v13 = vmul.f32 %v781_v6, %v449_v10 }
 0x3db   : > { %v464_v14 = vadd.f32 %v782_v9, %v457_v11 }
 0x3dc   : > { %v463_v15 = vadd.f32 %v782_v9, %v456_v13 }
 0x3dd   : > { %v466_v16 = vmax.f32 %v464_v14, 0.0 }
 0x3de   : > { %v465_v17 = vmax.f32 %v463_v15, 0.0 }
 0x3df   : > { %469 = vadd.xlane.f32.xlu1 %v466_v16 }
 0x3e0   : > { %467 = vadd.xlane.f32.xlu0 %v465_v17 }
 0x46c   : > { %v470_v30 = vpop.xlane.xlu1 %469 }
 0x46d   : > { %v472_v31 = vmul.f32 0.03125, %v470_v30  ;;  %v468_v32 = vpop.xlane.xlu0 %467 }
 0x46e   : > { %v471_v33 = vmul.f32 0.03125, %v468_v32 }
 0x46f   : > { %v474_v34 = vsub.f32 %v466_v16, %v472_v31 }
 0x470   : > { %v473_v35 = vsub.f32 %v465_v17, %v471_v33 }
 0x471   : > { %v476_v36 = vsel %vm434_vm1, %v474_v34, 0.0 }
 0x472   : > { %v478_v37 = vmul.f32 %v476_v36, %v476_v36  ;;  %v475_v38 = vsel %vm434_vm1, %v473_v35, 0.0 }
 0x473   : > { %v477_v39 = vmul.f32 %v475_v38, %v475_v38 }
 0x474   : > { %481 = vadd.xlane.f32.xlu1 %v478_v37 }
 0x475   : > { %479 = vadd.xlane.f32.xlu0 %v477_v39 }
 0x501   : > { %v482_v52 = vpop.xlane.xlu1 %481 }
 0x502   : > { %v484_v53 = vmul.f32 0.03125, %v482_v52  ;;  %v480_v54 = vpop.xlane.xlu0 %479 }
 0x503   : > { %v483_v55 = vmul.f32 0.03125, %v480_v54 }
 0x504   : > { %v486_v56 = vadd.f32 1e-05, %v484_v53 }
 0x505   : > { %v485_v57 = vadd.f32 1e-05, %v483_v55 }
 0x506   : > { %1053 = vrsqrt.f32 %v486_v56 }
 0x507   : > { %1055 = vrsqrt.f32 %v485_v57 }
 0x510   : > { %v1054_v58 = vpop.eup %1053 }
 0x511   : > { %v1056_v59 = vpop.eup %1055  ;;  %v490_v61 = vmul.f32 %v1054_v58, %v476_v36 }
 0x512   : > { %v489_v60 = vmul.f32 %v1056_v59, %v475_v38 }
 0x514   : > { %902 = vmatprep.mubr.f32.mxu1 %v489_v60 }
 0x515   : > { %903 = vmatmul.mubr.f32.vlgmr.msra.gmra.mrb[0].mxu1 %v490_v61 }
 0x5e8   : > { %v904_v63 = vpop.f32.mrb[0].mxu1 }
 0x5e9   : > { %v584_v0 = vadd.f32 %v904_v63, %v783_v62  ;;  %v578_v1 = vpop.f32.mrb[1].mxu1 }
 0x5ea   : > { %v579_v2 = vadd.f32 %v783_v62, %v578_v1 }
 0x5eb   : > { %589 = vadd.xlane.f32.xlu1 %v584_v0 }
 0x5ec   : > { %587 = vadd.xlane.f32.xlu0 %v579_v2 }
 0x678   : > { %v590_v3 = vpop.xlane.xlu1 %589 }
 0x679   : > { %v592_v4 = vmul.f32 0.015625, %v590_v3  ;;  %v588_v5 = vpop.xlane.xlu0 %587 }
 0x67a   : > { %v591_v6 = vmul.f32 0.015625, %v588_v5 }
 0x67b   : > { %v594_v7 = vsub.f32 %v584_v0, %v592_v4 }
 0x67c   : > { %v593_v8 = vsub.f32 %v579_v2, %v591_v6 }
 0x67d   : > { %v596_v9 = vsel %vm313_vm0, %v594_v7, 0.0 }
 0x67e   : > { %v598_v10 = vmul.f32 %v596_v9, %v596_v9  ;;  %v595_v11 = vsel %vm313_vm0, %v593_v8, 0.0 }
 0x67f   : > { %v597_v13 = vmul.f32 %v595_v11, %v595_v11 }
 0x680   : > { %601 = vadd.xlane.f32.xlu1 %v598_v10 }
 0x681   : > { %599 = vadd.xlane.f32.xlu0 %v597_v13 }
 0x70d   : > { %v602_v14 = vpop.xlane.xlu1 %601 }
 0x70e   : > { %v604_v15 = vmul.f32 0.015625, %v602_v14  ;;  %v600_v16 = vpop.xlane.xlu0 %599 }
 0x70f   : > { %v603_v17 = vmul.f32 0.015625, %v600_v16 }
 0x710   : > { %v606_v18 = vadd.f32 1e-05, %v604_v15 }
 0x711   : > { %v605_v19 = vadd.f32 1e-05, %v603_v17 }
 0x712   : > { %1057 = vrsqrt.f32 %v606_v18 }
 0x713   : > { %1059 = vrsqrt.f32 %v605_v19 }
 0x71c   : > { %v1058_v20 = vpop.eup %1057 }
 0x71d   : > { %v1060_v22 = vpop.eup %1059  ;;  %v610_v23 = vmul.f32 %v1058_v20, %v596_v9 }
 0x71e   : > { %v609_v24 = vmul.f32 %v1060_v22, %v595_v11 }
 0x71f   : > { %v617_v25 = vmul.f32 %v784_v21, %v610_v23 }
 0x720   : > { %v616_v26 = vmul.f32 %v784_v21, %v609_v24 }
 0x721   : > { %v624_v27 = vadd.f32 %v785_v12, %v617_v25 }
 0x722   : > { %v623_v28 = vadd.f32 %v785_v12, %v616_v26 }
 0x723   : > { %v787_v29 = vmul.f32 -1.442695, %v624_v27 }
 0x724   : > { %v786_v30 = vmul.f32 -1.442695, %v623_v28 }
 0x725   : > { %1061 = vpow2.f32 %v787_v29 }
 0x726   : > { %1063 = vpow2.f32 %v786_v30 }
 0x72f   : > { %v1062_v31 = vpop.eup %1061 }
 0x730   : > { %v1064_v32 = vpop.eup %1063  ;;  %v632_v33 = vadd.f32 1.0, %v1062_v31 }
 0x731   : > { %v631_v34 = vadd.f32 1.0, %v1064_v32 }
 0x732   : > { %1065 = vrcp.f32 %v632_v33 }
 0x733   : > { %1067 = vrcp.f32 %v631_v34 }
 0x738   : > { %646 = sbr.rel (!%p1630_p10) target bundleno = 1883 (0x75b), region = 60 }
 0x73c   : > { %v1066_v35 = vpop.eup %1065 }
 0x73d   : > { %v1068_v36 = vpop.eup %1067  ;;  %638 = vst [vmem:[%s290_s14 + $0x8] sm:$0xff] %v1066_v35 }
 0x73e   : > { %637 = vst [vmem:[%s290_s14] sm:$0xff] %v1068_v36 }
 0x73f   : > { %s1640_s25 = smov (!%p649_p1, %s648_s25), 2 }
 0x740   : > { %s1544_s13 = sshll.u32 %s1640_s25, 7 }
 0x741   : > { %s653_s28 = ssub.s32 256, %s1544_s13 }
 0x742   : > { %654 = vsyncadd %s640_s16, %s653_s28  ;;  %p791_p4 = scmp.ne.s32.totalorder %s1544_s13, 0  ;;  %s798_s15 = sshll.u32 %s1319_s22, 8 }
 0x743   : > { %s1554_s11 = scalar_lea.hbm %s1606_s5, %s798_s15  ;;  %s659_s27 = sshll.u32 %s290_s14, 4  ;;  %s1556_s27 = int_to_ptr.vmem [resolvable:$true] %s659_s27 }
 0x744   : > { %s1181_s23 = scalar_lea.vmem %s1556_s27, %s1544_s13  ;;  %s1265_s29 = smov [#allocation10]  }
 0x745   : > { %p1182_p3 = scmp.ne.s32.totalorder %s1556_s27, %s1181_s23  ;;  %s1185_s7 = sshll.u32 %s1265_s29, 4  ;;  %s1186_s7 = int_to_ptr.vmem [resolvable:$false] %s1185_s7 }
 0x746   : > { %s1187_s22 = scalar_lea.vmem %s1186_s7, 512  ;;  %p1188_p11 = scmp.lt.s32.totalorder %s1556_s27, %s1186_s7 }
 0x747   : > { %p1183_p5 = pnand %p1182_p3, %p791_p4  ;;  %p1189_p13 = scmp.lt.s32.totalorder %s1187_s22, %s1181_s23 }
 0x749   : > { %p1184_p6 = pneg %p1183_p5  ;;  %p1190_p12 = por %p1189_p13, %p1188_p11 }
 0x74b   : > { %p1191_p0 = pnand %p1190_p12, %p1184_p6 }
 0x74d   : > { %1194 = shalt.err (!%p1191_p0)
}
 0x74e   : > { %s1195_s10 = scalar_lea.hbm %s1554_s11, %s1544_s13  ;;  %s1199_s12 = scalar_lea.hbm %s1606_s5, 896 }
 0x74f   : > { %p1196_p2 = scmp.ne.s32.totalorder %s1554_s11, %s1195_s10  ;;  %p1200_p9 = scmp.lt.u32.totalorder %s1554_s11, %s1606_s5 }
 0x750   : > { %p1201_p10 = scmp.lt.u32.totalorder %s1199_s12, %s1195_s10  ;;  %p1203_p3 = scmp.lt.u32.totalorder %s1195_s10, %s1554_s11 }
 0x751   : > { %p1197_p7 = pnand %p1196_p2, %p791_p4 }
 0x752   : > { %p1202_p1 = por %p1201_p10, %p1200_p9 }
 0x753   : > { %p1198_p8 = pneg %p1197_p7 }
 0x754   : > { %p1204_p5 = por %p1203_p3, %p1202_p1 }
 0x756   : > { %p1205_p6 = pnand %p1204_p5, %p1198_p8 }
 0x758   : > { %1208 = shalt.err (!%p1205_p6)
}
 0x759   : > { %s1266_s25 = smov 128   ;;  %s1267_s28 = smov 8  }
 0x75a   : > { %665 = dma.vmem_to_hbm [thread:$0]  (%p791_p4), %s1556_s27, %s1544_s13, %s1554_s11, %s640_s16, %s1266_s25, %s1266_s25, %s1267_s28  }
 0x75b PF: > { %p1003_p11 = scmp.ge.s32.totalorder %s1255_s21, 2  ;;  %s674_s15 = sand.u32 1, %s1243_s18  }
 0x75c   : > { %p1631_p13 = scmp.ne.s32.totalorder %s1618_s6, 0  ;;  %s675_s30 = scalar_lea.sflag [#allocation4], %s674_s15 }
 0x75e   : > { %p994_p12 = pnand %p1003_p11, %p1631_p13 }
 0x760   : > { %1238 = dma.done.wait (!%p994_p12), %s675_s30, 256  }
 0x761   : > { %1240 = vsyncadd (!%p994_p12), %s675_s30, 4294967040  ;;  %s1632_s21 = sld [smem:[#allocation15_spill]]  ;;  %s1633_s8 = sld [smem:[#allocation16_spill]] }
 0x762   : > { %s1634_s18 = smov %s1247_s19  ;;  %s1635_s19 = smov %s1251_s20 }
 0x767   : > { %p20_p0 = scmp.ge.s32.totalorder %s1632_s21, 6   ;;  %s1636_s20 = smov %s1633_s8 }
 0x769   :  { %22 = sbr.rel (!%p20_p0) target bundleno = 7 (0x7), region = 97 }
 0x770   :  { %680 = vsyncpa [#allocation3], 1 }
 0x771   :  { %682 = vsyncpa [#allocation3 + $0x1], 1 }
 0x772   :  { %683 = vsyncpa [#allocation6], 1 }
 0x773   :  { %684 = vsyncpa [#allocation9], 1 }
 0x774   :  { %685 = vsyncpa [#allocation4], 1 }
 0x775   :  { %687 = vsyncpa [#allocation4 + $0x1], 1 }

</bundles_post_ra>
